<compile_context>
chip_gen: v7x
topology: tpu7x:2x2x1
jax: 0.10.0
libtpu: 0.0.40
codegen_flags: <defaults>
</compile_context>

<pallas_src>
import functools
import math

import jax
import jax.numpy as jnp
from jax.experimental import pallas as pl
from jax.experimental.pallas import tpu as pltpu


def _sam1_kernel(x_ref, w_ref, mask_ref, o_ref, pad_ref, *, C, H, W):
    """Fused sAM1 forward for one batch element.

    x_ref:    (1, C, H, W)   VMEM  input activations (NCHW block)
    w_ref:    (50,)          SMEM  conv weight, flat index = c*25 + ky*5 + kx
    mask_ref: (H, W)         VMEM  spatial mask (shared across batch)
    o_ref:    (1, 1, H, W)   VMEM  output attention map
    pad_ref:  (2, H+4, W+4)  VMEM  zero-padded [mean, max] planes (scratch)
    """
    # ---- channel-wise mean / max (unrolled over C; keeps live vregs tiny) ----
    acc_sum = x_ref[0, 0]
    acc_max = x_ref[0, 0]
    for c in range(1, C):
        xc = x_ref[0, c]
        acc_sum = acc_sum + xc
        acc_max = jnp.maximum(acc_max, xc)
    mean = acc_sum * (1.0 / C)

    # ---- in-kernel zero padding (halo = 2) for the 5x5 conv ----
    pad_ref[...] = jnp.zeros_like(pad_ref)
    pad_ref[0, 2:2 + H, 2:2 + W] = mean
    pad_ref[1, 2:2 + H, 2:2 + W] = acc_max

    # ---- 5x5 conv (2 -> 1 channels, no bias): 50 scalar-broadcast FMAs ----
    acc = jnp.zeros((H, W), jnp.float32)
    for ky in range(5):
        for kx in range(5):
            w_avg = w_ref[ky * 5 + kx]         # scalar load from SMEM
            w_max = w_ref[25 + ky * 5 + kx]    # scalar load from SMEM
            acc = acc + pad_ref[0, ky:ky + H, kx:kx + W] * w_avg
            acc = acc + pad_ref[1, ky:ky + H, kx:kx + W] * w_max

    # ---- mask + spatial softmax over all H*W positions, scaled by H*W/2 ----
    m = mask_ref[...]
    s = acc * m + (1.0 - m) * (-1e8)
    s_max = jnp.max(s)
    p = jnp.exp(s - s_max)
    p = p * ((H * W * 0.5) / jnp.sum(p))
    o_ref[0, 0] = p


def sam1_forward(x, w_flat, mask):
    """sAM1 forward.

    x:      (N, C, H, W) f32, NCHW (PyTorch layout, consumed directly)
    w_flat: (50,) f32, Conv2d(2, 1, 5, bias=False) weight flattened as
            [c * 25 + ky * 5 + kx]
    mask:   (H, W) f32
    returns (N, 1, H, W) f32 attention map
    """
    N, C, H, W = x.shape
    kern = functools.partial(_sam1_kernel, C=C, H=H, W=W)
    return pl.pallas_call(
        kern,
        out_shape=jax.ShapeDtypeStruct((N, 1, H, W), jnp.float32),
        grid=(N,),
        in_specs=[
            pl.BlockSpec((1, C, H, W), lambda n: (n, 0, 0, 0)),
            pl.BlockSpec(memory_space=pltpu.MemorySpace.SMEM),   # 50 weights
            pl.BlockSpec((H, W), lambda n: (0, 0)),
        ],
        out_specs=pl.BlockSpec((1, 1, H, W), lambda n: (n, 0, 0, 0)),
        scratch_shapes=[pltpu.VMEM((2, H + 4, W + 4), jnp.float32)],
        compiler_params=pltpu.CompilerParams(
            dimension_semantics=("parallel",)),
    )(x, w_flat, mask)


def _reference(x, w_flat, mask):
    """Pure-JAX reference of the PyTorch module (for a correctness check)."""
    w = w_flat.reshape(1, 2, 5, 5)
    avg = jnp.mean(x, axis=1, keepdims=True)
    mx = jnp.max(x, axis=1, keepdims=True)
    s = jnp.concatenate([avg, mx], axis=1)
    s = jax.lax.conv_general_dilated(
        s, w, window_strides=(1, 1), padding=[(2, 2), (2, 2)],
        dimension_numbers=("NCHW", "OIHW", "NCHW"))
    s = s * mask + (1.0 - mask) * (-1e8)
    n, c, h, wdt = s.shape
    p = jax.nn.softmax(s.reshape(n, c, -1), axis=2)
    return p.reshape(s.shape) * (h * wdt * 0.5)


if __name__ == "__main__":
    key = jax.random.PRNGKey(0)
    k_w, k_x = jax.random.split(key)

    N, C, H, W = 2, 32, 16, 16

    # Conv2d(2, 1, 5, bias=False) weight, PyTorch-style uniform init, flattened.
    fan_in = 2 * 5 * 5
    bound = 1.0 / math.sqrt(fan_in)
    w_flat = jax.random.uniform(k_w, (2, 5, 5), jnp.float32,
                                minval=-bound, maxval=bound).reshape(-1)

    x = jax.random.normal(k_x, (N, C, H, W), dtype=jnp.float32)        # NCHW
    mask = jnp.ones((H, W), jnp.float32).at[0, :].set(0.0)             # deterministic mask

    out = sam1_forward(x, w_flat, mask)
    out = jax.block_until_ready(out)

    assert out.shape == (N, 1, H, W)
    assert bool(jnp.all(jnp.isfinite(out)))

    ref = _reference(x, w_flat, mask)
    assert bool(jnp.allclose(out, ref, atol=1e-2, rtol=1e-3)), \
        float(jnp.max(jnp.abs(out - ref)))

    print("KERNEL_OK")
</pallas_src>

<mosaic_0001>
module attributes {stable_mosaic.version = 11 : i64} {
  func.func @_sam1_kernel(%arg0: i32, %arg1: memref<1x32x16x16xf32, #tpu.memory_space<vmem>>, %arg2: memref<50xf32, #tpu.memory_space<smem>>, %arg3: memref<16x16xf32, #tpu.memory_space<vmem>>, %arg4: memref<1x1x16x16xf32, #tpu.memory_space<vmem>>, %arg5: memref<2x20x20xf32, #tpu.memory_space<vmem>>) attributes {dimension_semantics = [#tpu.dimension_semantics<parallel>], iteration_bounds = array<i64: 2>, scalar_prefetch = 0 : i64, scratch_operands = 1 : i64, tpu.core_type = #tpu.core_type<tc>, window_params = [{transform_indices = @transform_0, window_bounds = array<i64: 1, 32, 16, 16>}, {transform_indices = @transform_1, window_bounds = array<i64: 50>}, {pipeline_mode = #tpu.pipeline_mode<synchronous>, transform_indices = @transform_2, window_bounds = array<i64: 16, 16>}, {transform_indices = @transform_3, window_bounds = array<i64: 1, 1, 16, 16>}]} {
    %c0 = arith.constant 0 : index
    %c0_0 = arith.constant 0 : index
    %c0_1 = arith.constant 0 : index
    %c0_2 = arith.constant 0 : index
    %0 = vector.load %arg1[%c0, %c0_0, %c0_1, %c0_2] : memref<1x32x16x16xf32, #tpu.memory_space<vmem>>, vector<1x1x16x16xf32>
    %1 = vector.shape_cast %0 : vector<1x1x16x16xf32> to vector<16x16xf32>
    %c0_3 = arith.constant 0 : index
    %c0_4 = arith.constant 0 : index
    %c0_5 = arith.constant 0 : index
    %c0_6 = arith.constant 0 : index
    %2 = vector.load %arg1[%c0_3, %c0_4, %c0_5, %c0_6] : memref<1x32x16x16xf32, #tpu.memory_space<vmem>>, vector<1x1x16x16xf32>
    %3 = vector.shape_cast %2 : vector<1x1x16x16xf32> to vector<16x16xf32>
    %c0_7 = arith.constant 0 : index
    %c1 = arith.constant 1 : index
    %c0_8 = arith.constant 0 : index
    %c0_9 = arith.constant 0 : index
    %4 = vector.load %arg1[%c0_7, %c1, %c0_8, %c0_9] : memref<1x32x16x16xf32, #tpu.memory_space<vmem>>, vector<1x1x16x16xf32>
    %5 = vector.shape_cast %4 : vector<1x1x16x16xf32> to vector<16x16xf32>
    %6 = arith.addf %1, %5 : vector<16x16xf32>
    %7 = arith.maximumf %3, %5 : vector<16x16xf32>
    %c0_10 = arith.constant 0 : index
    %c2 = arith.constant 2 : index
    %c0_11 = arith.constant 0 : index
    %c0_12 = arith.constant 0 : index
    %8 = vector.load %arg1[%c0_10, %c2, %c0_11, %c0_12] : memref<1x32x16x16xf32, #tpu.memory_space<vmem>>, vector<1x1x16x16xf32>
    %9 = vector.shape_cast %8 : vector<1x1x16x16xf32> to vector<16x16xf32>
    %10 = arith.addf %6, %9 : vector<16x16xf32>
    %11 = arith.maximumf %7, %9 : vector<16x16xf32>
    %c0_13 = arith.constant 0 : index
    %c3 = arith.constant 3 : index
    %c0_14 = arith.constant 0 : index
    %c0_15 = arith.constant 0 : index
    %12 = vector.load %arg1[%c0_13, %c3, %c0_14, %c0_15] : memref<1x32x16x16xf32, #tpu.memory_space<vmem>>, vector<1x1x16x16xf32>
    %13 = vector.shape_cast %12 : vector<1x1x16x16xf32> to vector<16x16xf32>
    %14 = arith.addf %10, %13 : vector<16x16xf32>
    %15 = arith.maximumf %11, %13 : vector<16x16xf32>
    %c0_16 = arith.constant 0 : index
    %c4 = arith.constant 4 : index
    %c0_17 = arith.constant 0 : index
    %c0_18 = arith.constant 0 : index
    %16 = vector.load %arg1[%c0_16, %c4, %c0_17, %c0_18] : memref<1x32x16x16xf32, #tpu.memory_space<vmem>>, vector<1x1x16x16xf32>
    %17 = vector.shape_cast %16 : vector<1x1x16x16xf32> to vector<16x16xf32>
    %18 = arith.addf %14, %17 : vector<16x16xf32>
    %19 = arith.maximumf %15, %17 : vector<16x16xf32>
    %c0_19 = arith.constant 0 : index
    %c5 = arith.constant 5 : index
    %c0_20 = arith.constant 0 : index
    %c0_21 = arith.constant 0 : index
    %20 = vector.load %arg1[%c0_19, %c5, %c0_20, %c0_21] : memref<1x32x16x16xf32, #tpu.memory_space<vmem>>, vector<1x1x16x16xf32>
    %21 = vector.shape_cast %20 : vector<1x1x16x16xf32> to vector<16x16xf32>
    %22 = arith.addf %18, %21 : vector<16x16xf32>
    %23 = arith.maximumf %19, %21 : vector<16x16xf32>
    %c0_22 = arith.constant 0 : index
    %c6 = arith.constant 6 : index
    %c0_23 = arith.constant 0 : index
    %c0_24 = arith.constant 0 : index
    %24 = vector.load %arg1[%c0_22, %c6, %c0_23, %c0_24] : memref<1x32x16x16xf32, #tpu.memory_space<vmem>>, vector<1x1x16x16xf32>
    %25 = vector.shape_cast %24 : vector<1x1x16x16xf32> to vector<16x16xf32>
    %26 = arith.addf %22, %25 : vector<16x16xf32>
    %27 = arith.maximumf %23, %25 : vector<16x16xf32>
    %c0_25 = arith.constant 0 : index
    %c7 = arith.constant 7 : index
    %c0_26 = arith.constant 0 : index
    %c0_27 = arith.constant 0 : index
    %28 = vector.load %arg1[%c0_25, %c7, %c0_26, %c0_27] : memref<1x32x16x16xf32, #tpu.memory_space<vmem>>, vector<1x1x16x16xf32>
    %29 = vector.shape_cast %28 : vector<1x1x16x16xf32> to vector<16x16xf32>
    %30 = arith.addf %26, %29 : vector<16x16xf32>
    %31 = arith.maximumf %27, %29 : vector<16x16xf32>
    %c0_28 = arith.constant 0 : index
    %c8 = arith.constant 8 : index
    %c0_29 = arith.constant 0 : index
    %c0_30 = arith.constant 0 : index
    %32 = vector.load %arg1[%c0_28, %c8, %c0_29, %c0_30] : memref<1x32x16x16xf32, #tpu.memory_space<vmem>>, vector<1x1x16x16xf32>
    %33 = vector.shape_cast %32 : vector<1x1x16x16xf32> to vector<16x16xf32>
    %34 = arith.addf %30, %33 : vector<16x16xf32>
    %35 = arith.maximumf %31, %33 : vector<16x16xf32>
    %c0_31 = arith.constant 0 : index
    %c9 = arith.constant 9 : index
    %c0_32 = arith.constant 0 : index
    %c0_33 = arith.constant 0 : index
    %36 = vector.load %arg1[%c0_31, %c9, %c0_32, %c0_33] : memref<1x32x16x16xf32, #tpu.memory_space<vmem>>, vector<1x1x16x16xf32>
    %37 = vector.shape_cast %36 : vector<1x1x16x16xf32> to vector<16x16xf32>
    %38 = arith.addf %34, %37 : vector<16x16xf32>
    %39 = arith.maximumf %35, %37 : vector<16x16xf32>
    %c0_34 = arith.constant 0 : index
    %c10 = arith.constant 10 : index
    %c0_35 = arith.constant 0 : index
    %c0_36 = arith.constant 0 : index
    %40 = vector.load %arg1[%c0_34, %c10, %c0_35, %c0_36] : memref<1x32x16x16xf32, #tpu.memory_space<vmem>>, vector<1x1x16x16xf32>
    %41 = vector.shape_cast %40 : vector<1x1x16x16xf32> to vector<16x16xf32>
    %42 = arith.addf %38, %41 : vector<16x16xf32>
    %43 = arith.maximumf %39, %41 : vector<16x16xf32>
    %c0_37 = arith.constant 0 : index
    %c11 = arith.constant 11 : index
    %c0_38 = arith.constant 0 : index
    %c0_39 = arith.constant 0 : index
    %44 = vector.load %arg1[%c0_37, %c11, %c0_38, %c0_39] : memref<1x32x16x16xf32, #tpu.memory_space<vmem>>, vector<1x1x16x16xf32>
    %45 = vector.shape_cast %44 : vector<1x1x16x16xf32> to vector<16x16xf32>
    %46 = arith.addf %42, %45 : vector<16x16xf32>
    %47 = arith.maximumf %43, %45 : vector<16x16xf32>
    %c0_40 = arith.constant 0 : index
    %c12 = arith.constant 12 : index
    %c0_41 = arith.constant 0 : index
    %c0_42 = arith.constant 0 : index
    %48 = vector.load %arg1[%c0_40, %c12, %c0_41, %c0_42] : memref<1x32x16x16xf32, #tpu.memory_space<vmem>>, vector<1x1x16x16xf32>
    %49 = vector.shape_cast %48 : vector<1x1x16x16xf32> to vector<16x16xf32>
    %50 = arith.addf %46, %49 : vector<16x16xf32>
    %51 = arith.maximumf %47, %49 : vector<16x16xf32>
    %c0_43 = arith.constant 0 : index
    %c13 = arith.constant 13 : index
    %c0_44 = arith.constant 0 : index
    %c0_45 = arith.constant 0 : index
    %52 = vector.load %arg1[%c0_43, %c13, %c0_44, %c0_45] : memref<1x32x16x16xf32, #tpu.memory_space<vmem>>, vector<1x1x16x16xf32>
    %53 = vector.shape_cast %52 : vector<1x1x16x16xf32> to vector<16x16xf32>
    %54 = arith.addf %50, %53 : vector<16x16xf32>
    %55 = arith.maximumf %51, %53 : vector<16x16xf32>
    %c0_46 = arith.constant 0 : index
    %c14 = arith.constant 14 : index
    %c0_47 = arith.constant 0 : index
    %c0_48 = arith.constant 0 : index
    %56 = vector.load %arg1[%c0_46, %c14, %c0_47, %c0_48] : memref<1x32x16x16xf32, #tpu.memory_space<vmem>>, vector<1x1x16x16xf32>
    %57 = vector.shape_cast %56 : vector<1x1x16x16xf32> to vector<16x16xf32>
    %58 = arith.addf %54, %57 : vector<16x16xf32>
    %59 = arith.maximumf %55, %57 : vector<16x16xf32>
    %c0_49 = arith.constant 0 : index
    %c15 = arith.constant 15 : index
    %c0_50 = arith.constant 0 : index
    %c0_51 = arith.constant 0 : index
    %60 = vector.load %arg1[%c0_49, %c15, %c0_50, %c0_51] : memref<1x32x16x16xf32, #tpu.memory_space<vmem>>, vector<1x1x16x16xf32>
    %61 = vector.shape_cast %60 : vector<1x1x16x16xf32> to vector<16x16xf32>
    %62 = arith.addf %58, %61 : vector<16x16xf32>
    %63 = arith.maximumf %59, %61 : vector<16x16xf32>
    %c0_52 = arith.constant 0 : index
    %c16 = arith.constant 16 : index
    %c0_53 = arith.constant 0 : index
    %c0_54 = arith.constant 0 : index
    %64 = vector.load %arg1[%c0_52, %c16, %c0_53, %c0_54] : memref<1x32x16x16xf32, #tpu.memory_space<vmem>>, vector<1x1x16x16xf32>
    %65 = vector.shape_cast %64 : vector<1x1x16x16xf32> to vector<16x16xf32>
    %66 = arith.addf %62, %65 : vector<16x16xf32>
    %67 = arith.maximumf %63, %65 : vector<16x16xf32>
    %c0_55 = arith.constant 0 : index
    %c17 = arith.constant 17 : index
    %c0_56 = arith.constant 0 : index
    %c0_57 = arith.constant 0 : index
    %68 = vector.load %arg1[%c0_55, %c17, %c0_56, %c0_57] : memref<1x32x16x16xf32, #tpu.memory_space<vmem>>, vector<1x1x16x16xf32>
    %69 = vector.shape_cast %68 : vector<1x1x16x16xf32> to vector<16x16xf32>
    %70 = arith.addf %66, %69 : vector<16x16xf32>
    %71 = arith.maximumf %67, %69 : vector<16x16xf32>
    %c0_58 = arith.constant 0 : index
    %c18 = arith.constant 18 : index
    %c0_59 = arith.constant 0 : index
    %c0_60 = arith.constant 0 : index
    %72 = vector.load %arg1[%c0_58, %c18, %c0_59, %c0_60] : memref<1x32x16x16xf32, #tpu.memory_space<vmem>>, vector<1x1x16x16xf32>
    %73 = vector.shape_cast %72 : vector<1x1x16x16xf32> to vector<16x16xf32>
    %74 = arith.addf %70, %73 : vector<16x16xf32>
    %75 = arith.maximumf %71, %73 : vector<16x16xf32>
    %c0_61 = arith.constant 0 : index
    %c19 = arith.constant 19 : index
    %c0_62 = arith.constant 0 : index
    %c0_63 = arith.constant 0 : index
    %76 = vector.load %arg1[%c0_61, %c19, %c0_62, %c0_63] : memref<1x32x16x16xf32, #tpu.memory_space<vmem>>, vector<1x1x16x16xf32>
    %77 = vector.shape_cast %76 : vector<1x1x16x16xf32> to vector<16x16xf32>
    %78 = arith.addf %74, %77 : vector<16x16xf32>
    %79 = arith.maximumf %75, %77 : vector<16x16xf32>
    %c0_64 = arith.constant 0 : index
    %c20 = arith.constant 20 : index
    %c0_65 = arith.constant 0 : index
    %c0_66 = arith.constant 0 : index
    %80 = vector.load %arg1[%c0_64, %c20, %c0_65, %c0_66] : memref<1x32x16x16xf32, #tpu.memory_space<vmem>>, vector<1x1x16x16xf32>
    %81 = vector.shape_cast %80 : vector<1x1x16x16xf32> to vector<16x16xf32>
    %82 = arith.addf %78, %81 : vector<16x16xf32>
    %83 = arith.maximumf %79, %81 : vector<16x16xf32>
    %c0_67 = arith.constant 0 : index
    %c21 = arith.constant 21 : index
    %c0_68 = arith.constant 0 : index
    %c0_69 = arith.constant 0 : index
    %84 = vector.load %arg1[%c0_67, %c21, %c0_68, %c0_69] : memref<1x32x16x16xf32, #tpu.memory_space<vmem>>, vector<1x1x16x16xf32>
    %85 = vector.shape_cast %84 : vector<1x1x16x16xf32> to vector<16x16xf32>
    %86 = arith.addf %82, %85 : vector<16x16xf32>
    %87 = arith.maximumf %83, %85 : vector<16x16xf32>
    %c0_70 = arith.constant 0 : index
    %c22 = arith.constant 22 : index
    %c0_71 = arith.constant 0 : index
    %c0_72 = arith.constant 0 : index
    %88 = vector.load %arg1[%c0_70, %c22, %c0_71, %c0_72] : memref<1x32x16x16xf32, #tpu.memory_space<vmem>>, vector<1x1x16x16xf32>
    %89 = vector.shape_cast %88 : vector<1x1x16x16xf32> to vector<16x16xf32>
    %90 = arith.addf %86, %89 : vector<16x16xf32>
    %91 = arith.maximumf %87, %89 : vector<16x16xf32>
    %c0_73 = arith.constant 0 : index
    %c23 = arith.constant 23 : index
    %c0_74 = arith.constant 0 : index
    %c0_75 = arith.constant 0 : index
    %92 = vector.load %arg1[%c0_73, %c23, %c0_74, %c0_75] : memref<1x32x16x16xf32, #tpu.memory_space<vmem>>, vector<1x1x16x16xf32>
    %93 = vector.shape_cast %92 : vector<1x1x16x16xf32> to vector<16x16xf32>
    %94 = arith.addf %90, %93 : vector<16x16xf32>
    %95 = arith.maximumf %91, %93 : vector<16x16xf32>
    %c0_76 = arith.constant 0 : index
    %c24 = arith.constant 24 : index
    %c0_77 = arith.constant 0 : index
    %c0_78 = arith.constant 0 : index
    %96 = vector.load %arg1[%c0_76, %c24, %c0_77, %c0_78] : memref<1x32x16x16xf32, #tpu.memory_space<vmem>>, vector<1x1x16x16xf32>
    %97 = vector.shape_cast %96 : vector<1x1x16x16xf32> to vector<16x16xf32>
    %98 = arith.addf %94, %97 : vector<16x16xf32>
    %99 = arith.maximumf %95, %97 : vector<16x16xf32>
    %c0_79 = arith.constant 0 : index
    %c25 = arith.constant 25 : index
    %c0_80 = arith.constant 0 : index
    %c0_81 = arith.constant 0 : index
    %100 = vector.load %arg1[%c0_79, %c25, %c0_80, %c0_81] : memref<1x32x16x16xf32, #tpu.memory_space<vmem>>, vector<1x1x16x16xf32>
    %101 = vector.shape_cast %100 : vector<1x1x16x16xf32> to vector<16x16xf32>
    %102 = arith.addf %98, %101 : vector<16x16xf32>
    %103 = arith.maximumf %99, %101 : vector<16x16xf32>
    %c0_82 = arith.constant 0 : index
    %c26 = arith.constant 26 : index
    %c0_83 = arith.constant 0 : index
    %c0_84 = arith.constant 0 : index
    %104 = vector.load %arg1[%c0_82, %c26, %c0_83, %c0_84] : memref<1x32x16x16xf32, #tpu.memory_space<vmem>>, vector<1x1x16x16xf32>
    %105 = vector.shape_cast %104 : vector<1x1x16x16xf32> to vector<16x16xf32>
    %106 = arith.addf %102, %105 : vector<16x16xf32>
    %107 = arith.maximumf %103, %105 : vector<16x16xf32>
    %c0_85 = arith.constant 0 : index
    %c27 = arith.constant 27 : index
    %c0_86 = arith.constant 0 : index
    %c0_87 = arith.constant 0 : index
    %108 = vector.load %arg1[%c0_85, %c27, %c0_86, %c0_87] : memref<1x32x16x16xf32, #tpu.memory_space<vmem>>, vector<1x1x16x16xf32>
    %109 = vector.shape_cast %108 : vector<1x1x16x16xf32> to vector<16x16xf32>
    %110 = arith.addf %106, %109 : vector<16x16xf32>
    %111 = arith.maximumf %107, %109 : vector<16x16xf32>
    %c0_88 = arith.constant 0 : index
    %c28 = arith.constant 28 : index
    %c0_89 = arith.constant 0 : index
    %c0_90 = arith.constant 0 : index
    %112 = vector.load %arg1[%c0_88, %c28, %c0_89, %c0_90] : memref<1x32x16x16xf32, #tpu.memory_space<vmem>>, vector<1x1x16x16xf32>
    %113 = vector.shape_cast %112 : vector<1x1x16x16xf32> to vector<16x16xf32>
    %114 = arith.addf %110, %113 : vector<16x16xf32>
    %115 = arith.maximumf %111, %113 : vector<16x16xf32>
    %c0_91 = arith.constant 0 : index
    %c29 = arith.constant 29 : index
    %c0_92 = arith.constant 0 : index
    %c0_93 = arith.constant 0 : index
    %116 = vector.load %arg1[%c0_91, %c29, %c0_92, %c0_93] : memref<1x32x16x16xf32, #tpu.memory_space<vmem>>, vector<1x1x16x16xf32>
    %117 = vector.shape_cast %116 : vector<1x1x16x16xf32> to vector<16x16xf32>
    %118 = arith.addf %114, %117 : vector<16x16xf32>
    %119 = arith.maximumf %115, %117 : vector<16x16xf32>
    %c0_94 = arith.constant 0 : index
    %c30 = arith.constant 30 : index
    %c0_95 = arith.constant 0 : index
    %c0_96 = arith.constant 0 : index
    %120 = vector.load %arg1[%c0_94, %c30, %c0_95, %c0_96] : memref<1x32x16x16xf32, #tpu.memory_space<vmem>>, vector<1x1x16x16xf32>
    %121 = vector.shape_cast %120 : vector<1x1x16x16xf32> to vector<16x16xf32>
    %122 = arith.addf %118, %121 : vector<16x16xf32>
    %123 = arith.maximumf %119, %121 : vector<16x16xf32>
    %c0_97 = arith.constant 0 : index
    %c31 = arith.constant 31 : index
    %c0_98 = arith.constant 0 : index
    %c0_99 = arith.constant 0 : index
    %124 = vector.load %arg1[%c0_97, %c31, %c0_98, %c0_99] : memref<1x32x16x16xf32, #tpu.memory_space<vmem>>, vector<1x1x16x16xf32>
    %125 = vector.shape_cast %124 : vector<1x1x16x16xf32> to vector<16x16xf32>
    %126 = arith.addf %122, %125 : vector<16x16xf32>
    %127 = arith.maximumf %123, %125 : vector<16x16xf32>
    %cst = arith.constant 3.125000e-02 : f32
    %128 = vector.broadcast %cst : f32 to vector<16x16xf32>
    %129 = arith.mulf %126, %128 : vector<16x16xf32>
    %cst_100 = arith.constant 0.000000e+00 : f32
    %130 = vector.broadcast %cst_100 : f32 to vector<2x20x20xf32>
    %c0_101 = arith.constant 0 : index
    %c0_102 = arith.constant 0 : index
    %c0_103 = arith.constant 0 : index
    %131 = vector.load %arg5[%c0_101, %c0_102, %c0_103] : memref<2x20x20xf32, #tpu.memory_space<vmem>>, vector<2x20x20xf32>
    tpu.vector_store %arg5[%c0_101, %c0_102, %c0_103], %130 {strides = array<i32>} : memref<2x20x20xf32, #tpu.memory_space<vmem>>, vector<2x20x20xf32>,
    %c0_104 = arith.constant 0 : index
    %c2_105 = arith.constant 2 : index
    %c2_106 = arith.constant 2 : index
    %132 = vector.load %arg5[%c0_104, %c2_105, %c2_106] : memref<2x20x20xf32, #tpu.memory_space<vmem>>, vector<1x16x16xf32>
    %133 = vector.shape_cast %132 : vector<1x16x16xf32> to vector<16x16xf32>
    %134 = vector.shape_cast %129 : vector<16x16xf32> to vector<1x16x16xf32>
    tpu.vector_store %arg5[%c0_104, %c2_105, %c2_106], %134 {strides = array<i32>} : memref<2x20x20xf32, #tpu.memory_space<vmem>>, vector<1x16x16xf32>,
    %c1_107 = arith.constant 1 : index
    %c2_108 = arith.constant 2 : index
    %c2_109 = arith.constant 2 : index
    %135 = vector.load %arg5[%c1_107, %c2_108, %c2_109] : memref<2x20x20xf32, #tpu.memory_space<vmem>>, vector<1x16x16xf32>
    %136 = vector.shape_cast %135 : vector<1x16x16xf32> to vector<16x16xf32>
    %137 = vector.shape_cast %127 : vector<16x16xf32> to vector<1x16x16xf32>
    tpu.vector_store %arg5[%c1_107, %c2_108, %c2_109], %137 {strides = array<i32>} : memref<2x20x20xf32, #tpu.memory_space<vmem>>, vector<1x16x16xf32>,
    %cst_110 = arith.constant 0.000000e+00 : f32
    %138 = vector.broadcast %cst_110 : f32 to vector<16x16xf32>
    %c0_111 = arith.constant 0 : index
    %139 = memref.load %arg2[%c0_111] : memref<50xf32, #tpu.memory_space<smem>>
    %c25_112 = arith.constant 25 : index
    %140 = memref.load %arg2[%c25_112] : memref<50xf32, #tpu.memory_space<smem>>
    %c0_113 = arith.constant 0 : index
    %c0_114 = arith.constant 0 : index
    %c0_115 = arith.constant 0 : index
    %141 = vector.load %arg5[%c0_113, %c0_114, %c0_115] : memref<2x20x20xf32, #tpu.memory_space<vmem>>, vector<1x16x16xf32>
    %142 = vector.shape_cast %141 : vector<1x16x16xf32> to vector<16x16xf32>
    %143 = vector.broadcast %139 : f32 to vector<16x16xf32>
    %144 = arith.mulf %142, %143 : vector<16x16xf32>
    %145 = arith.addf %138, %144 : vector<16x16xf32>
    %c1_116 = arith.constant 1 : index
    %c0_117 = arith.constant 0 : index
    %c0_118 = arith.constant 0 : index
    %146 = vector.load %arg5[%c1_116, %c0_117, %c0_118] : memref<2x20x20xf32, #tpu.memory_space<vmem>>, vector<1x16x16xf32>
    %147 = vector.shape_cast %146 : vector<1x16x16xf32> to vector<16x16xf32>
    %148 = vector.broadcast %140 : f32 to vector<16x16xf32>
    %149 = arith.mulf %147, %148 : vector<16x16xf32>
    %150 = arith.addf %145, %149 : vector<16x16xf32>
    %c1_119 = arith.constant 1 : index
    %151 = memref.load %arg2[%c1_119] : memref<50xf32, #tpu.memory_space<smem>>
    %c26_120 = arith.constant 26 : index
    %152 = memref.load %arg2[%c26_120] : memref<50xf32, #tpu.memory_space<smem>>
    %c0_121 = arith.constant 0 : index
    %c0_122 = arith.constant 0 : index
    %c1_123 = arith.constant 1 : index
    %153 = vector.load %arg5[%c0_121, %c0_122, %c1_123] : memref<2x20x20xf32, #tpu.memory_space<vmem>>, vector<1x16x16xf32>
    %154 = vector.shape_cast %153 : vector<1x16x16xf32> to vector<16x16xf32>
    %155 = vector.broadcast %151 : f32 to vector<16x16xf32>
    %156 = arith.mulf %154, %155 : vector<16x16xf32>
    %157 = arith.addf %150, %156 : vector<16x16xf32>
    %c1_124 = arith.constant 1 : index
    %c0_125 = arith.constant 0 : index
    %c1_126 = arith.constant 1 : index
    %158 = vector.load %arg5[%c1_124, %c0_125, %c1_126] : memref<2x20x20xf32, #tpu.memory_space<vmem>>, vector<1x16x16xf32>
    %159 = vector.shape_cast %158 : vector<1x16x16xf32> to vector<16x16xf32>
    %160 = vector.broadcast %152 : f32 to vector<16x16xf32>
    %161 = arith.mulf %159, %160 : vector<16x16xf32>
    %162 = arith.addf %157, %161 : vector<16x16xf32>
    %c2_127 = arith.constant 2 : index
    %163 = memref.load %arg2[%c2_127] : memref<50xf32, #tpu.memory_space<smem>>
    %c27_128 = arith.constant 27 : index
    %164 = memref.load %arg2[%c27_128] : memref<50xf32, #tpu.memory_space<smem>>
    %c0_129 = arith.constant 0 : index
    %c0_130 = arith.constant 0 : index
    %c2_131 = arith.constant 2 : index
    %165 = vector.load %arg5[%c0_129, %c0_130, %c2_131] : memref<2x20x20xf32, #tpu.memory_space<vmem>>, vector<1x16x16xf32>
    %166 = vector.shape_cast %165 : vector<1x16x16xf32> to vector<16x16xf32>
    %167 = vector.broadcast %163 : f32 to vector<16x16xf32>
    %168 = arith.mulf %166, %167 : vector<16x16xf32>
    %169 = arith.addf %162, %168 : vector<16x16xf32>
    %c1_132 = arith.constant 1 : index
    %c0_133 = arith.constant 0 : index
    %c2_134 = arith.constant 2 : index
    %170 = vector.load %arg5[%c1_132, %c0_133, %c2_134] : memref<2x20x20xf32, #tpu.memory_space<vmem>>, vector<1x16x16xf32>
    %171 = vector.shape_cast %170 : vector<1x16x16xf32> to vector<16x16xf32>
    %172 = vector.broadcast %164 : f32 to vector<16x16xf32>
    %173 = arith.mulf %171, %172 : vector<16x16xf32>
    %174 = arith.addf %169, %173 : vector<16x16xf32>
    %c3_135 = arith.constant 3 : index
    %175 = memref.load %arg2[%c3_135] : memref<50xf32, #tpu.memory_space<smem>>
    %c28_136 = arith.constant 28 : index
    %176 = memref.load %arg2[%c28_136] : memref<50xf32, #tpu.memory_space<smem>>
    %c0_137 = arith.constant 0 : index
    %c0_138 = arith.constant 0 : index
    %c3_139 = arith.constant 3 : index
    %177 = vector.load %arg5[%c0_137, %c0_138, %c3_139] : memref<2x20x20xf32, #tpu.memory_space<vmem>>, vector<1x16x16xf32>
    %178 = vector.shape_cast %177 : vector<1x16x16xf32> to vector<16x16xf32>
    %179 = vector.broadcast %175 : f32 to vector<16x16xf32>
    %180 = arith.mulf %178, %179 : vector<16x16xf32>
    %181 = arith.addf %174, %180 : vector<16x16xf32>
    %c1_140 = arith.constant 1 : index
    %c0_141 = arith.constant 0 : index
    %c3_142 = arith.constant 3 : index
    %182 = vector.load %arg5[%c1_140, %c0_141, %c3_142] : memref<2x20x20xf32, #tpu.memory_space<vmem>>, vector<1x16x16xf32>
    %183 = vector.shape_cast %182 : vector<1x16x16xf32> to vector<16x16xf32>
    %184 = vector.broadcast %176 : f32 to vector<16x16xf32>
    %185 = arith.mulf %183, %184 : vector<16x16xf32>
    %186 = arith.addf %181, %185 : vector<16x16xf32>
    %c4_143 = arith.constant 4 : index
    %187 = memref.load %arg2[%c4_143] : memref<50xf32, #tpu.memory_space<smem>>
    %c29_144 = arith.constant 29 : index
    %188 = memref.load %arg2[%c29_144] : memref<50xf32, #tpu.memory_space<smem>>
    %c0_145 = arith.constant 0 : index
    %c0_146 = arith.constant 0 : index
    %c4_147 = arith.constant 4 : index
    %189 = vector.load %arg5[%c0_145, %c0_146, %c4_147] : memref<2x20x20xf32, #tpu.memory_space<vmem>>, vector<1x16x16xf32>
    %190 = vector.shape_cast %189 : vector<1x16x16xf32> to vector<16x16xf32>
    %191 = vector.broadcast %187 : f32 to vector<16x16xf32>
    %192 = arith.mulf %190, %191 : vector<16x16xf32>
    %193 = arith.addf %186, %192 : vector<16x16xf32>
    %c1_148 = arith.constant 1 : index
    %c0_149 = arith.constant 0 : index
    %c4_150 = arith.constant 4 : index
    %194 = vector.load %arg5[%c1_148, %c0_149, %c4_150] : memref<2x20x20xf32, #tpu.memory_space<vmem>>, vector<1x16x16xf32>
    %195 = vector.shape_cast %194 : vector<1x16x16xf32> to vector<16x16xf32>
    %196 = vector.broadcast %188 : f32 to vector<16x16xf32>
    %197 = arith.mulf %195, %196 : vector<16x16xf32>
    %198 = arith.addf %193, %197 : vector<16x16xf32>
    %c5_151 = arith.constant 5 : index
    %199 = memref.load %arg2[%c5_151] : memref<50xf32, #tpu.memory_space<smem>>
    %c30_152 = arith.constant 30 : index
    %200 = memref.load %arg2[%c30_152] : memref<50xf32, #tpu.memory_space<smem>>
    %c0_153 = arith.constant 0 : index
    %c1_154 = arith.constant 1 : index
    %c0_155 = arith.constant 0 : index
    %201 = vector.load %arg5[%c0_153, %c1_154, %c0_155] : memref<2x20x20xf32, #tpu.memory_space<vmem>>, vector<1x16x16xf32>
    %202 = vector.shape_cast %201 : vector<1x16x16xf32> to vector<16x16xf32>
    %203 = vector.broadcast %199 : f32 to vector<16x16xf32>
    %204 = arith.mulf %202, %203 : vector<16x16xf32>
    %205 = arith.addf %198, %204 : vector<16x16xf32>
    %c1_156 = arith.constant 1 : index
    %c1_157 = arith.constant 1 : index
    %c0_158 = arith.constant 0 : index
    %206 = vector.load %arg5[%c1_156, %c1_157, %c0_158] : memref<2x20x20xf32, #tpu.memory_space<vmem>>, vector<1x16x16xf32>
    %207 = vector.shape_cast %206 : vector<1x16x16xf32> to vector<16x16xf32>
    %208 = vector.broadcast %200 : f32 to vector<16x16xf32>
    %209 = arith.mulf %207, %208 : vector<16x16xf32>
    %210 = arith.addf %205, %209 : vector<16x16xf32>
    %c6_159 = arith.constant 6 : index
    %211 = memref.load %arg2[%c6_159] : memref<50xf32, #tpu.memory_space<smem>>
    %c31_160 = arith.constant 31 : index
    %212 = memref.load %arg2[%c31_160] : memref<50xf32, #tpu.memory_space<smem>>
    %c0_161 = arith.constant 0 : index
    %c1_162 = arith.constant 1 : index
    %c1_163 = arith.constant 1 : index
    %213 = vector.load %arg5[%c0_161, %c1_162, %c1_163] : memref<2x20x20xf32, #tpu.memory_space<vmem>>, vector<1x16x16xf32>
    %214 = vector.shape_cast %213 : vector<1x16x16xf32> to vector<16x16xf32>
    %215 = vector.broadcast %211 : f32 to vector<16x16xf32>
    %216 = arith.mulf %214, %215 : vector<16x16xf32>
    %217 = arith.addf %210, %216 : vector<16x16xf32>
    %c1_164 = arith.constant 1 : index
    %c1_165 = arith.constant 1 : index
    %c1_166 = arith.constant 1 : index
    %218 = vector.load %arg5[%c1_164, %c1_165, %c1_166] : memref<2x20x20xf32, #tpu.memory_space<vmem>>, vector<1x16x16xf32>
    %219 = vector.shape_cast %218 : vector<1x16x16xf32> to vector<16x16xf32>
    %220 = vector.broadcast %212 : f32 to vector<16x16xf32>
    %221 = arith.mulf %219, %220 : vector<16x16xf32>
    %222 = arith.addf %217, %221 : vector<16x16xf32>
    %c7_167 = arith.constant 7 : index
    %223 = memref.load %arg2[%c7_167] : memref<50xf32, #tpu.memory_space<smem>>
    %c32 = arith.constant 32 : index
    %224 = memref.load %arg2[%c32] : memref<50xf32, #tpu.memory_space<smem>>
    %c0_168 = arith.constant 0 : index
    %c1_169 = arith.constant 1 : index
    %c2_170 = arith.constant 2 : index
    %225 = vector.load %arg5[%c0_168, %c1_169, %c2_170] : memref<2x20x20xf32, #tpu.memory_space<vmem>>, vector<1x16x16xf32>
    %226 = vector.shape_cast %225 : vector<1x16x16xf32> to vector<16x16xf32>
    %227 = vector.broadcast %223 : f32 to vector<16x16xf32>
    %228 = arith.mulf %226, %227 : vector<16x16xf32>
    %229 = arith.addf %222, %228 : vector<16x16xf32>
    %c1_171 = arith.constant 1 : index
    %c1_172 = arith.constant 1 : index
    %c2_173 = arith.constant 2 : index
    %230 = vector.load %arg5[%c1_171, %c1_172, %c2_173] : memref<2x20x20xf32, #tpu.memory_space<vmem>>, vector<1x16x16xf32>
    %231 = vector.shape_cast %230 : vector<1x16x16xf32> to vector<16x16xf32>
    %232 = vector.broadcast %224 : f32 to vector<16x16xf32>
    %233 = arith.mulf %231, %232 : vector<16x16xf32>
    %234 = arith.addf %229, %233 : vector<16x16xf32>
    %c8_174 = arith.constant 8 : index
    %235 = memref.load %arg2[%c8_174] : memref<50xf32, #tpu.memory_space<smem>>
    %c33 = arith.constant 33 : index
    %236 = memref.load %arg2[%c33] : memref<50xf32, #tpu.memory_space<smem>>
    %c0_175 = arith.constant 0 : index
    %c1_176 = arith.constant 1 : index
    %c3_177 = arith.constant 3 : index
    %237 = vector.load %arg5[%c0_175, %c1_176, %c3_177] : memref<2x20x20xf32, #tpu.memory_space<vmem>>, vector<1x16x16xf32>
    %238 = vector.shape_cast %237 : vector<1x16x16xf32> to vector<16x16xf32>
    %239 = vector.broadcast %235 : f32 to vector<16x16xf32>
    %240 = arith.mulf %238, %239 : vector<16x16xf32>
    %241 = arith.addf %234, %240 : vector<16x16xf32>
    %c1_178 = arith.constant 1 : index
    %c1_179 = arith.constant 1 : index
    %c3_180 = arith.constant 3 : index
    %242 = vector.load %arg5[%c1_178, %c1_179, %c3_180] : memref<2x20x20xf32, #tpu.memory_space<vmem>>, vector<1x16x16xf32>
    %243 = vector.shape_cast %242 : vector<1x16x16xf32> to vector<16x16xf32>
    %244 = vector.broadcast %236 : f32 to vector<16x16xf32>
    %245 = arith.mulf %243, %244 : vector<16x16xf32>
    %246 = arith.addf %241, %245 : vector<16x16xf32>
    %c9_181 = arith.constant 9 : index
    %247 = memref.load %arg2[%c9_181] : memref<50xf32, #tpu.memory_space<smem>>
    %c34 = arith.constant 34 : index
    %248 = memref.load %arg2[%c34] : memref<50xf32, #tpu.memory_space<smem>>
    %c0_182 = arith.constant 0 : index
    %c1_183 = arith.constant 1 : index
    %c4_184 = arith.constant 4 : index
    %249 = vector.load %arg5[%c0_182, %c1_183, %c4_184] : memref<2x20x20xf32, #tpu.memory_space<vmem>>, vector<1x16x16xf32>
    %250 = vector.shape_cast %249 : vector<1x16x16xf32> to vector<16x16xf32>
    %251 = vector.broadcast %247 : f32 to vector<16x16xf32>
    %252 = arith.mulf %250, %251 : vector<16x16xf32>
    %253 = arith.addf %246, %252 : vector<16x16xf32>
    %c1_185 = arith.constant 1 : index
    %c1_186 = arith.constant 1 : index
    %c4_187 = arith.constant 4 : index
    %254 = vector.load %arg5[%c1_185, %c1_186, %c4_187] : memref<2x20x20xf32, #tpu.memory_space<vmem>>, vector<1x16x16xf32>
    %255 = vector.shape_cast %254 : vector<1x16x16xf32> to vector<16x16xf32>
    %256 = vector.broadcast %248 : f32 to vector<16x16xf32>
    %257 = arith.mulf %255, %256 : vector<16x16xf32>
    %258 = arith.addf %253, %257 : vector<16x16xf32>
    %c10_188 = arith.constant 10 : index
    %259 = memref.load %arg2[%c10_188] : memref<50xf32, #tpu.memory_space<smem>>
    %c35 = arith.constant 35 : index
    %260 = memref.load %arg2[%c35] : memref<50xf32, #tpu.memory_space<smem>>
    %c0_189 = arith.constant 0 : index
    %c2_190 = arith.constant 2 : index
    %c0_191 = arith.constant 0 : index
    %261 = vector.load %arg5[%c0_189, %c2_190, %c0_191] : memref<2x20x20xf32, #tpu.memory_space<vmem>>, vector<1x16x16xf32>
    %262 = vector.shape_cast %261 : vector<1x16x16xf32> to vector<16x16xf32>
    %263 = vector.broadcast %259 : f32 to vector<16x16xf32>
    %264 = arith.mulf %262, %263 : vector<16x16xf32>
    %265 = arith.addf %258, %264 : vector<16x16xf32>
    %c1_192 = arith.constant 1 : index
    %c2_193 = arith.constant 2 : index
    %c0_194 = arith.constant 0 : index
    %266 = vector.load %arg5[%c1_192, %c2_193, %c0_194] : memref<2x20x20xf32, #tpu.memory_space<vmem>>, vector<1x16x16xf32>
    %267 = vector.shape_cast %266 : vector<1x16x16xf32> to vector<16x16xf32>
    %268 = vector.broadcast %260 : f32 to vector<16x16xf32>
    %269 = arith.mulf %267, %268 : vector<16x16xf32>
    %270 = arith.addf %265, %269 : vector<16x16xf32>
    %c11_195 = arith.constant 11 : index
    %271 = memref.load %arg2[%c11_195] : memref<50xf32, #tpu.memory_space<smem>>
    %c36 = arith.constant 36 : index
    %272 = memref.load %arg2[%c36] : memref<50xf32, #tpu.memory_space<smem>>
    %c0_196 = arith.constant 0 : index
    %c2_197 = arith.constant 2 : index
    %c1_198 = arith.constant 1 : index
    %273 = vector.load %arg5[%c0_196, %c2_197, %c1_198] : memref<2x20x20xf32, #tpu.memory_space<vmem>>, vector<1x16x16xf32>
    %274 = vector.shape_cast %273 : vector<1x16x16xf32> to vector<16x16xf32>
    %275 = vector.broadcast %271 : f32 to vector<16x16xf32>
    %276 = arith.mulf %274, %275 : vector<16x16xf32>
    %277 = arith.addf %270, %276 : vector<16x16xf32>
    %c1_199 = arith.constant 1 : index
    %c2_200 = arith.constant 2 : index
    %c1_201 = arith.constant 1 : index
    %278 = vector.load %arg5[%c1_199, %c2_200, %c1_201] : memref<2x20x20xf32, #tpu.memory_space<vmem>>, vector<1x16x16xf32>
    %279 = vector.shape_cast %278 : vector<1x16x16xf32> to vector<16x16xf32>
    %280 = vector.broadcast %272 : f32 to vector<16x16xf32>
    %281 = arith.mulf %279, %280 : vector<16x16xf32>
    %282 = arith.addf %277, %281 : vector<16x16xf32>
    %c12_202 = arith.constant 12 : index
    %283 = memref.load %arg2[%c12_202] : memref<50xf32, #tpu.memory_space<smem>>
    %c37 = arith.constant 37 : index
    %284 = memref.load %arg2[%c37] : memref<50xf32, #tpu.memory_space<smem>>
    %c0_203 = arith.constant 0 : index
    %c2_204 = arith.constant 2 : index
    %c2_205 = arith.constant 2 : index
    %285 = vector.load %arg5[%c0_203, %c2_204, %c2_205] : memref<2x20x20xf32, #tpu.memory_space<vmem>>, vector<1x16x16xf32>
    %286 = vector.shape_cast %285 : vector<1x16x16xf32> to vector<16x16xf32>
    %287 = vector.broadcast %283 : f32 to vector<16x16xf32>
    %288 = arith.mulf %286, %287 : vector<16x16xf32>
    %289 = arith.addf %282, %288 : vector<16x16xf32>
    %c1_206 = arith.constant 1 : index
    %c2_207 = arith.constant 2 : index
    %c2_208 = arith.constant 2 : index
    %290 = vector.load %arg5[%c1_206, %c2_207, %c2_208] : memref<2x20x20xf32, #tpu.memory_space<vmem>>, vector<1x16x16xf32>
    %291 = vector.shape_cast %290 : vector<1x16x16xf32> to vector<16x16xf32>
    %292 = vector.broadcast %284 : f32 to vector<16x16xf32>
    %293 = arith.mulf %291, %292 : vector<16x16xf32>
    %294 = arith.addf %289, %293 : vector<16x16xf32>
    %c13_209 = arith.constant 13 : index
    %295 = memref.load %arg2[%c13_209] : memref<50xf32, #tpu.memory_space<smem>>
    %c38 = arith.constant 38 : index
    %296 = memref.load %arg2[%c38] : memref<50xf32, #tpu.memory_space<smem>>
    %c0_210 = arith.constant 0 : index
    %c2_211 = arith.constant 2 : index
    %c3_212 = arith.constant 3 : index
    %297 = vector.load %arg5[%c0_210, %c2_211, %c3_212] : memref<2x20x20xf32, #tpu.memory_space<vmem>>, vector<1x16x16xf32>
    %298 = vector.shape_cast %297 : vector<1x16x16xf32> to vector<16x16xf32>
    %299 = vector.broadcast %295 : f32 to vector<16x16xf32>
    %300 = arith.mulf %298, %299 : vector<16x16xf32>
    %301 = arith.addf %294, %300 : vector<16x16xf32>
    %c1_213 = arith.constant 1 : index
    %c2_214 = arith.constant 2 : index
    %c3_215 = arith.constant 3 : index
    %302 = vector.load %arg5[%c1_213, %c2_214, %c3_215] : memref<2x20x20xf32, #tpu.memory_space<vmem>>, vector<1x16x16xf32>
    %303 = vector.shape_cast %302 : vector<1x16x16xf32> to vector<16x16xf32>
    %304 = vector.broadcast %296 : f32 to vector<16x16xf32>
    %305 = arith.mulf %303, %304 : vector<16x16xf32>
    %306 = arith.addf %301, %305 : vector<16x16xf32>
    %c14_216 = arith.constant 14 : index
    %307 = memref.load %arg2[%c14_216] : memref<50xf32, #tpu.memory_space<smem>>
    %c39 = arith.constant 39 : index
    %308 = memref.load %arg2[%c39] : memref<50xf32, #tpu.memory_space<smem>>
    %c0_217 = arith.constant 0 : index
    %c2_218 = arith.constant 2 : index
    %c4_219 = arith.constant 4 : index
    %309 = vector.load %arg5[%c0_217, %c2_218, %c4_219] : memref<2x20x20xf32, #tpu.memory_space<vmem>>, vector<1x16x16xf32>
    %310 = vector.shape_cast %309 : vector<1x16x16xf32> to vector<16x16xf32>
    %311 = vector.broadcast %307 : f32 to vector<16x16xf32>
    %312 = arith.mulf %310, %311 : vector<16x16xf32>
    %313 = arith.addf %306, %312 : vector<16x16xf32>
    %c1_220 = arith.constant 1 : index
    %c2_221 = arith.constant 2 : index
    %c4_222 = arith.constant 4 : index
    %314 = vector.load %arg5[%c1_220, %c2_221, %c4_222] : memref<2x20x20xf32, #tpu.memory_space<vmem>>, vector<1x16x16xf32>
    %315 = vector.shape_cast %314 : vector<1x16x16xf32> to vector<16x16xf32>
    %316 = vector.broadcast %308 : f32 to vector<16x16xf32>
    %317 = arith.mulf %315, %316 : vector<16x16xf32>
    %318 = arith.addf %313, %317 : vector<16x16xf32>
    %c15_223 = arith.constant 15 : index
    %319 = memref.load %arg2[%c15_223] : memref<50xf32, #tpu.memory_space<smem>>
    %c40 = arith.constant 40 : index
    %320 = memref.load %arg2[%c40] : memref<50xf32, #tpu.memory_space<smem>>
    %c0_224 = arith.constant 0 : index
    %c3_225 = arith.constant 3 : index
    %c0_226 = arith.constant 0 : index
    %321 = vector.load %arg5[%c0_224, %c3_225, %c0_226] : memref<2x20x20xf32, #tpu.memory_space<vmem>>, vector<1x16x16xf32>
    %322 = vector.shape_cast %321 : vector<1x16x16xf32> to vector<16x16xf32>
    %323 = vector.broadcast %319 : f32 to vector<16x16xf32>
    %324 = arith.mulf %322, %323 : vector<16x16xf32>
    %325 = arith.addf %318, %324 : vector<16x16xf32>
    %c1_227 = arith.constant 1 : index
    %c3_228 = arith.constant 3 : index
    %c0_229 = arith.constant 0 : index
    %326 = vector.load %arg5[%c1_227, %c3_228, %c0_229] : memref<2x20x20xf32, #tpu.memory_space<vmem>>, vector<1x16x16xf32>
    %327 = vector.shape_cast %326 : vector<1x16x16xf32> to vector<16x16xf32>
    %328 = vector.broadcast %320 : f32 to vector<16x16xf32>
    %329 = arith.mulf %327, %328 : vector<16x16xf32>
    %330 = arith.addf %325, %329 : vector<16x16xf32>
    %c16_230 = arith.constant 16 : index
    %331 = memref.load %arg2[%c16_230] : memref<50xf32, #tpu.memory_space<smem>>
    %c41 = arith.constant 41 : index
    %332 = memref.load %arg2[%c41] : memref<50xf32, #tpu.memory_space<smem>>
    %c0_231 = arith.constant 0 : index
    %c3_232 = arith.constant 3 : index
    %c1_233 = arith.constant 1 : index
    %333 = vector.load %arg5[%c0_231, %c3_232, %c1_233] : memref<2x20x20xf32, #tpu.memory_space<vmem>>, vector<1x16x16xf32>
    %334 = vector.shape_cast %333 : vector<1x16x16xf32> to vector<16x16xf32>
    %335 = vector.broadcast %331 : f32 to vector<16x16xf32>
    %336 = arith.mulf %334, %335 : vector<16x16xf32>
    %337 = arith.addf %330, %336 : vector<16x16xf32>
    %c1_234 = arith.constant 1 : index
    %c3_235 = arith.constant 3 : index
    %c1_236 = arith.constant 1 : index
    %338 = vector.load %arg5[%c1_234, %c3_235, %c1_236] : memref<2x20x20xf32, #tpu.memory_space<vmem>>, vector<1x16x16xf32>
    %339 = vector.shape_cast %338 : vector<1x16x16xf32> to vector<16x16xf32>
    %340 = vector.broadcast %332 : f32 to vector<16x16xf32>
    %341 = arith.mulf %339, %340 : vector<16x16xf32>
    %342 = arith.addf %337, %341 : vector<16x16xf32>
    %c17_237 = arith.constant 17 : index
    %343 = memref.load %arg2[%c17_237] : memref<50xf32, #tpu.memory_space<smem>>
    %c42 = arith.constant 42 : index
    %344 = memref.load %arg2[%c42] : memref<50xf32, #tpu.memory_space<smem>>
    %c0_238 = arith.constant 0 : index
    %c3_239 = arith.constant 3 : index
    %c2_240 = arith.constant 2 : index
    %345 = vector.load %arg5[%c0_238, %c3_239, %c2_240] : memref<2x20x20xf32, #tpu.memory_space<vmem>>, vector<1x16x16xf32>
    %346 = vector.shape_cast %345 : vector<1x16x16xf32> to vector<16x16xf32>
    %347 = vector.broadcast %343 : f32 to vector<16x16xf32>
    %348 = arith.mulf %346, %347 : vector<16x16xf32>
    %349 = arith.addf %342, %348 : vector<16x16xf32>
    %c1_241 = arith.constant 1 : index
    %c3_242 = arith.constant 3 : index
    %c2_243 = arith.constant 2 : index
    %350 = vector.load %arg5[%c1_241, %c3_242, %c2_243] : memref<2x20x20xf32, #tpu.memory_space<vmem>>, vector<1x16x16xf32>
    %351 = vector.shape_cast %350 : vector<1x16x16xf32> to vector<16x16xf32>
    %352 = vector.broadcast %344 : f32 to vector<16x16xf32>
    %353 = arith.mulf %351, %352 : vector<16x16xf32>
    %354 = arith.addf %349, %353 : vector<16x16xf32>
    %c18_244 = arith.constant 18 : index
    %355 = memref.load %arg2[%c18_244] : memref<50xf32, #tpu.memory_space<smem>>
    %c43 = arith.constant 43 : index
    %356 = memref.load %arg2[%c43] : memref<50xf32, #tpu.memory_space<smem>>
    %c0_245 = arith.constant 0 : index
    %c3_246 = arith.constant 3 : index
    %c3_247 = arith.constant 3 : index
    %357 = vector.load %arg5[%c0_245, %c3_246, %c3_247] : memref<2x20x20xf32, #tpu.memory_space<vmem>>, vector<1x16x16xf32>
    %358 = vector.shape_cast %357 : vector<1x16x16xf32> to vector<16x16xf32>
    %359 = vector.broadcast %355 : f32 to vector<16x16xf32>
    %360 = arith.mulf %358, %359 : vector<16x16xf32>
    %361 = arith.addf %354, %360 : vector<16x16xf32>
    %c1_248 = arith.constant 1 : index
    %c3_249 = arith.constant 3 : index
    %c3_250 = arith.constant 3 : index
    %362 = vector.load %arg5[%c1_248, %c3_249, %c3_250] : memref<2x20x20xf32, #tpu.memory_space<vmem>>, vector<1x16x16xf32>
    %363 = vector.shape_cast %362 : vector<1x16x16xf32> to vector<16x16xf32>
    %364 = vector.broadcast %356 : f32 to vector<16x16xf32>
    %365 = arith.mulf %363, %364 : vector<16x16xf32>
    %366 = arith.addf %361, %365 : vector<16x16xf32>
    %c19_251 = arith.constant 19 : index
    %367 = memref.load %arg2[%c19_251] : memref<50xf32, #tpu.memory_space<smem>>
    %c44 = arith.constant 44 : index
    %368 = memref.load %arg2[%c44] : memref<50xf32, #tpu.memory_space<smem>>
    %c0_252 = arith.constant 0 : index
    %c3_253 = arith.constant 3 : index
    %c4_254 = arith.constant 4 : index
    %369 = vector.load %arg5[%c0_252, %c3_253, %c4_254] : memref<2x20x20xf32, #tpu.memory_space<vmem>>, vector<1x16x16xf32>
    %370 = vector.shape_cast %369 : vector<1x16x16xf32> to vector<16x16xf32>
    %371 = vector.broadcast %367 : f32 to vector<16x16xf32>
    %372 = arith.mulf %370, %371 : vector<16x16xf32>
    %373 = arith.addf %366, %372 : vector<16x16xf32>
    %c1_255 = arith.constant 1 : index
    %c3_256 = arith.constant 3 : index
    %c4_257 = arith.constant 4 : index
    %374 = vector.load %arg5[%c1_255, %c3_256, %c4_257] : memref<2x20x20xf32, #tpu.memory_space<vmem>>, vector<1x16x16xf32>
    %375 = vector.shape_cast %374 : vector<1x16x16xf32> to vector<16x16xf32>
    %376 = vector.broadcast %368 : f32 to vector<16x16xf32>
    %377 = arith.mulf %375, %376 : vector<16x16xf32>
    %378 = arith.addf %373, %377 : vector<16x16xf32>
    %c20_258 = arith.constant 20 : index
    %379 = memref.load %arg2[%c20_258] : memref<50xf32, #tpu.memory_space<smem>>
    %c45 = arith.constant 45 : index
    %380 = memref.load %arg2[%c45] : memref<50xf32, #tpu.memory_space<smem>>
    %c0_259 = arith.constant 0 : index
    %c4_260 = arith.constant 4 : index
    %c0_261 = arith.constant 0 : index
    %381 = vector.load %arg5[%c0_259, %c4_260, %c0_261] : memref<2x20x20xf32, #tpu.memory_space<vmem>>, vector<1x16x16xf32>
    %382 = vector.shape_cast %381 : vector<1x16x16xf32> to vector<16x16xf32>
    %383 = vector.broadcast %379 : f32 to vector<16x16xf32>
    %384 = arith.mulf %382, %383 : vector<16x16xf32>
    %385 = arith.addf %378, %384 : vector<16x16xf32>
    %c1_262 = arith.constant 1 : index
    %c4_263 = arith.constant 4 : index
    %c0_264 = arith.constant 0 : index
    %386 = vector.load %arg5[%c1_262, %c4_263, %c0_264] : memref<2x20x20xf32, #tpu.memory_space<vmem>>, vector<1x16x16xf32>
    %387 = vector.shape_cast %386 : vector<1x16x16xf32> to vector<16x16xf32>
    %388 = vector.broadcast %380 : f32 to vector<16x16xf32>
    %389 = arith.mulf %387, %388 : vector<16x16xf32>
    %390 = arith.addf %385, %389 : vector<16x16xf32>
    %c21_265 = arith.constant 21 : index
    %391 = memref.load %arg2[%c21_265] : memref<50xf32, #tpu.memory_space<smem>>
    %c46 = arith.constant 46 : index
    %392 = memref.load %arg2[%c46] : memref<50xf32, #tpu.memory_space<smem>>
    %c0_266 = arith.constant 0 : index
    %c4_267 = arith.constant 4 : index
    %c1_268 = arith.constant 1 : index
    %393 = vector.load %arg5[%c0_266, %c4_267, %c1_268] : memref<2x20x20xf32, #tpu.memory_space<vmem>>, vector<1x16x16xf32>
    %394 = vector.shape_cast %393 : vector<1x16x16xf32> to vector<16x16xf32>
    %395 = vector.broadcast %391 : f32 to vector<16x16xf32>
    %396 = arith.mulf %394, %395 : vector<16x16xf32>
    %397 = arith.addf %390, %396 : vector<16x16xf32>
    %c1_269 = arith.constant 1 : index
    %c4_270 = arith.constant 4 : index
    %c1_271 = arith.constant 1 : index
    %398 = vector.load %arg5[%c1_269, %c4_270, %c1_271] : memref<2x20x20xf32, #tpu.memory_space<vmem>>, vector<1x16x16xf32>
    %399 = vector.shape_cast %398 : vector<1x16x16xf32> to vector<16x16xf32>
    %400 = vector.broadcast %392 : f32 to vector<16x16xf32>
    %401 = arith.mulf %399, %400 : vector<16x16xf32>
    %402 = arith.addf %397, %401 : vector<16x16xf32>
    %c22_272 = arith.constant 22 : index
    %403 = memref.load %arg2[%c22_272] : memref<50xf32, #tpu.memory_space<smem>>
    %c47 = arith.constant 47 : index
    %404 = memref.load %arg2[%c47] : memref<50xf32, #tpu.memory_space<smem>>
    %c0_273 = arith.constant 0 : index
    %c4_274 = arith.constant 4 : index
    %c2_275 = arith.constant 2 : index
    %405 = vector.load %arg5[%c0_273, %c4_274, %c2_275] : memref<2x20x20xf32, #tpu.memory_space<vmem>>, vector<1x16x16xf32>
    %406 = vector.shape_cast %405 : vector<1x16x16xf32> to vector<16x16xf32>
    %407 = vector.broadcast %403 : f32 to vector<16x16xf32>
    %408 = arith.mulf %406, %407 : vector<16x16xf32>
    %409 = arith.addf %402, %408 : vector<16x16xf32>
    %c1_276 = arith.constant 1 : index
    %c4_277 = arith.constant 4 : index
    %c2_278 = arith.constant 2 : index
    %410 = vector.load %arg5[%c1_276, %c4_277, %c2_278] : memref<2x20x20xf32, #tpu.memory_space<vmem>>, vector<1x16x16xf32>
    %411 = vector.shape_cast %410 : vector<1x16x16xf32> to vector<16x16xf32>
    %412 = vector.broadcast %404 : f32 to vector<16x16xf32>
    %413 = arith.mulf %411, %412 : vector<16x16xf32>
    %414 = arith.addf %409, %413 : vector<16x16xf32>
    %c23_279 = arith.constant 23 : index
    %415 = memref.load %arg2[%c23_279] : memref<50xf32, #tpu.memory_space<smem>>
    %c48 = arith.constant 48 : index
    %416 = memref.load %arg2[%c48] : memref<50xf32, #tpu.memory_space<smem>>
    %c0_280 = arith.constant 0 : index
    %c4_281 = arith.constant 4 : index
    %c3_282 = arith.constant 3 : index
    %417 = vector.load %arg5[%c0_280, %c4_281, %c3_282] : memref<2x20x20xf32, #tpu.memory_space<vmem>>, vector<1x16x16xf32>
    %418 = vector.shape_cast %417 : vector<1x16x16xf32> to vector<16x16xf32>
    %419 = vector.broadcast %415 : f32 to vector<16x16xf32>
    %420 = arith.mulf %418, %419 : vector<16x16xf32>
    %421 = arith.addf %414, %420 : vector<16x16xf32>
    %c1_283 = arith.constant 1 : index
    %c4_284 = arith.constant 4 : index
    %c3_285 = arith.constant 3 : index
    %422 = vector.load %arg5[%c1_283, %c4_284, %c3_285] : memref<2x20x20xf32, #tpu.memory_space<vmem>>, vector<1x16x16xf32>
    %423 = vector.shape_cast %422 : vector<1x16x16xf32> to vector<16x16xf32>
    %424 = vector.broadcast %416 : f32 to vector<16x16xf32>
    %425 = arith.mulf %423, %424 : vector<16x16xf32>
    %426 = arith.addf %421, %425 : vector<16x16xf32>
    %c24_286 = arith.constant 24 : index
    %427 = memref.load %arg2[%c24_286] : memref<50xf32, #tpu.memory_space<smem>>
    %c49 = arith.constant 49 : index
    %428 = memref.load %arg2[%c49] : memref<50xf32, #tpu.memory_space<smem>>
    %c0_287 = arith.constant 0 : index
    %c4_288 = arith.constant 4 : index
    %c4_289 = arith.constant 4 : index
    %429 = vector.load %arg5[%c0_287, %c4_288, %c4_289] : memref<2x20x20xf32, #tpu.memory_space<vmem>>, vector<1x16x16xf32>
    %430 = vector.shape_cast %429 : vector<1x16x16xf32> to vector<16x16xf32>
    %431 = vector.broadcast %427 : f32 to vector<16x16xf32>
    %432 = arith.mulf %430, %431 : vector<16x16xf32>
    %433 = arith.addf %426, %432 : vector<16x16xf32>
    %c1_290 = arith.constant 1 : index
    %c4_291 = arith.constant 4 : index
    %c4_292 = arith.constant 4 : index
    %434 = vector.load %arg5[%c1_290, %c4_291, %c4_292] : memref<2x20x20xf32, #tpu.memory_space<vmem>>, vector<1x16x16xf32>
    %435 = vector.shape_cast %434 : vector<1x16x16xf32> to vector<16x16xf32>
    %436 = vector.broadcast %428 : f32 to vector<16x16xf32>
    %437 = arith.mulf %435, %436 : vector<16x16xf32>
    %438 = arith.addf %433, %437 : vector<16x16xf32>
    %c0_293 = arith.constant 0 : index
    %c0_294 = arith.constant 0 : index
    %439 = vector.load %arg3[%c0_293, %c0_294] : memref<16x16xf32, #tpu.memory_space<vmem>>, vector<16x16xf32>
    %440 = arith.mulf %438, %439 : vector<16x16xf32>
    %cst_295 = arith.constant 1.000000e+00 : f32
    %441 = vector.broadcast %cst_295 : f32 to vector<16x16xf32>
    %442 = arith.subf %441, %439 : vector<16x16xf32>
    %cst_296 = arith.constant -1.000000e+08 : f32
    %443 = vector.broadcast %cst_296 : f32 to vector<16x16xf32>
    %444 = arith.mulf %442, %443 : vector<16x16xf32>
    %445 = arith.addf %440, %444 : vector<16x16xf32>
    %446 = vector.shape_cast %445 : vector<16x16xf32> to vector<1x16x16xf32>
    %cst_297 = arith.constant dense<0xFF800000> : vector<1xf32>
    %447 = vector.multi_reduction <maximumf>, %446, %cst_297 [1, 2] : vector<1x16x16xf32> to vector<1xf32>
    %448 = vector.shape_cast %447 : vector<1xf32> to vector<1x1x1xf32>
    %449 = vector.extract %448[0, 0, 0] : f32 from vector<1x1x1xf32>
    %450 = vector.broadcast %449 : f32 to vector<16x16xf32>
    %451 = arith.subf %445, %450 : vector<16x16xf32>
    %452 = math.exp %451 : vector<16x16xf32>
    %453 = vector.shape_cast %452 : vector<16x16xf32> to vector<1x16x16xf32>
    %cst_298 = arith.constant dense<0.000000e+00> : vector<1xf32>
    %454 = vector.multi_reduction <add>, %453, %cst_298 [1, 2] : vector<1x16x16xf32> to vector<1xf32>
    %455 = vector.shape_cast %454 : vector<1xf32> to vector<1x1x1xf32>
    %456 = vector.extract %455[0, 0, 0] : f32 from vector<1x1x1xf32>
    %cst_299 = arith.constant 1.280000e+02 : f32
    %457 = arith.divf %cst_299, %456 : f32
    %458 = vector.broadcast %457 : f32 to vector<16x16xf32>
    %459 = arith.mulf %452, %458 : vector<16x16xf32>
    %c0_300 = arith.constant 0 : index
    %c0_301 = arith.constant 0 : index
    %c0_302 = arith.constant 0 : index
    %c0_303 = arith.constant 0 : index
    %460 = vector.load %arg4[%c0_300, %c0_301, %c0_302, %c0_303] : memref<1x1x16x16xf32, #tpu.memory_space<vmem>>, vector<1x1x16x16xf32>
    %461 = vector.shape_cast %460 : vector<1x1x16x16xf32> to vector<16x16xf32>
    %462 = vector.shape_cast %459 : vector<16x16xf32> to vector<1x1x16x16xf32>
    tpu.vector_store %arg4[%c0_300, %c0_301, %c0_302, %c0_303], %462 {strides = array<i32>} : memref<1x1x16x16xf32, #tpu.memory_space<vmem>>, vector<1x1x16x16xf32>,
    return
  }
  func.func @transform_0(%arg0: i32) -> (i32, i32, i32, i32) {
    %c0_i32 = arith.constant 0 : i32
    %c0_i32_0 = arith.constant 0 : i32
    %c0_i32_1 = arith.constant 0 : i32
    %c0_i32_2 = arith.constant 0 : i32
    return %arg0, %c0_i32, %c0_i32_0, %c0_i32_1 : i32, i32, i32, i32
  }
  func.func @transform_1(%arg0: i32) -> i32 {
    %c0_i32 = arith.constant 0 : i32
    %c0_i32_0 = arith.constant 0 : i32
    return %c0_i32 : i32
  }
  func.func @transform_2(%arg0: i32) -> (i32, i32) {
    %c0_i32 = arith.constant 0 : i32
    %c0_i32_0 = arith.constant 0 : i32
    %c0_i32_1 = arith.constant 0 : i32
    return %c0_i32, %c0_i32_0 : i32, i32
  }
  func.func @transform_3(%arg0: i32) -> (i32, i32, i32, i32) {
    %c0_i32 = arith.constant 0 : i32
    %c0_i32_0 = arith.constant 0 : i32
    %c0_i32_1 = arith.constant 0 : i32
    %c0_i32_2 = arith.constant 0 : i32
    return %arg0, %c0_i32, %c0_i32_0, %c0_i32_1 : i32, i32, i32, i32
  }
}

</mosaic_0001>

<bundles_post_ra>
// kernel: tpu_custom_call.1
= control target key start
LH: loop header
LB: loop body
LE: loop exit
PB: predicated region body
PF: predicated region fallthrough
CT: control target
= control target key end

     0   :  { %8 = vsyncpa [#allocation5], 0  ;;  %s2196_s0 = inlined_call_operand.vmem [shape: f32[2,32,16,16], index: 0, kind: input, shape index: {}]   ;;  %s2197_s1 = inlined_call_operand.vmem [shape: f32[50], index: 1, kind: input, shape index: {}]   ;;  %s2198_s2 = inlined_call_operand.vmem [shape: f32[16,16], index: 2, kind: input, shape index: {}]   ;;  %s2199_s3 = inlined_call_operand.hbm [shape: f32[2,1,16,16], index: 3, kind: output, shape index: {}]  }
   0x1   :  { %9 = vsyncpa [#allocation4], 0 }
   0x2   :  { %11 = vsyncpa [#allocation4 + $0x1], 0  ;;  %s1523_s12 = smov 0   ;;  %s1525_s13 = smov 0  }
   0x3   :  { %s1527_s14 = smov 0   ;;  %s1529_s15 = smov 0  }
   0x4 LB: > { %s1544_s16 = sadd.s32 4294967295, %s1491_s15   ;;  %s1213_s17 = sadd.s32 4294967294, %s1491_s15   ;;  %s1491_s15 = sphi %s1529_s15, %s2206_s15   ;;  %s1487_s14 = sphi %s1527_s14, %s2205_s14   ;;  %s1483_s13 = sphi %s1525_s13, %s2204_s13   ;;  %s1479_s12 = sphi %s1523_s12, %s2203_s12  }
   0x5   : > { %s1548_s18 = sadd.s32 1, %s1491_s15   ;;  %s92_s19 = sadd.s32 1, %s1487_s14 }
   0x6   : > { %s89_s20 = ssub.s32 %s1491_s15, %s1548_s18  ;;  %p102_p0 = scmp.ne.s32.totalorder %s1487_s14, %s1483_s13 }
   0x7   : > { %p90_p1 = scmp.eq.s32.totalorder %s89_s20, 0  ;;  %p103_p2 = scmp.eq.s32.totalorder %s1544_s16, 1 }
   0x8   : > { %p108_p3 = scmp.ne.s32.totalorder %s1483_s13, %s1479_s12  ;;  %p109_p4 = scmp.eq.s32.totalorder %s1213_s17, 1 }
   0x9   : > { %s1559_s21 = scalar_select %p90_p1, %s1487_s14, %s92_s19  }
   0xa   : > { %p1561_p5 = por %p103_p2, %p102_p0  ;;  %p1565_p6 = por %p109_p4, %p108_p3 }
   0xb   : > { %p1214_p7 = scmp.ge.s32.totalorder %s1491_s15, 1  ;;  %p116_p8 = scmp.lt.s32.totalorder %s1491_s15, 3 }
   0xc   : > { %p1360_p9 = scmp.eq.s32.totalorder %s1544_s16, 0  ;;  %s129_s27 = sshll.u32 %s2197_s1, 4  ;;  %s130_s27 = int_to_ptr.vmem [resolvable:$true] %s129_s27 }
   0xd   : > { %p1572_p10 = pnand %p1214_p7, %p116_p8  ;;  %s1410_s28 = scalar_lea.vmem %s130_s27, 16 }
   0xe   : > { %p1411_p13 = scmp.ne.s32.totalorder %s130_s27, %s1410_s28  ;;  %p1418_p3 = scmp.lt.s32.totalorder %s130_s27, %s130_s27 }
   0xf   : > { %p1352_p11 = pneg %p1572_p10  ;;  %p1419_p4 = scmp.lt.s32.totalorder %s1410_s28, %s1410_s28 }
  0x11   : > { %p1353_p12 = pnand %p1360_p9, %p1352_p11  ;;  %p1420_p7 = por %p1419_p4, %p1418_p3 }
  0x13   : > { %p1412_p0 = pneg %p1353_p12 }
  0x15   : > { %p1413_p1 = pnand %p1412_p0, %p1411_p13 }
  0x17   : > { %p1414_p2 = pneg %p1413_p1 }
  0x19   : > { %p1421_p8 = pnand %p1420_p7, %p1414_p2 }
  0x1b   : > { %1424 = shalt.err (!%p1421_p8)
}
  0x1c   : > { %s1493_s29 = smov [#allocation3]   ;;  %153 = sbr.rel (%p1572_p10) target bundleno = 1026 (0x402), region = 32 }
  0x1d   : > { %1355 = dma.vmem_to_smem (!%p1353_p12), %s130_s27, 16, %s1493_s29, [#allocation5]  }
  0x23   : > { %1470 = dma.done.wait (%p1360_p9), [#allocation5], 16  }
  0x24   : > { %1472 = vsyncadd (%p1360_p9), [#allocation5], 4294967280 }
  0x25   : > { %159 = sfence }
  0x26   : > { %p178_p11 = scmp.lt.s32.totalorder %s1544_s16, 1  ;;  %vm404_vm0 = vcmask 162816   ;;  %v1494_v0 = vmov 0.0   ;;  %vm407_vm1 = vcmask 158720   ;;  %s1495_s8 = smov 2   ;;  %vm420_vm2 = vcmask 146448  }
  0x27   : > { %409 = vst.msk [vmem:[#allocation2 + $0x18] sm:$0xff] %vm404_vm0, %v1494_v0  ;;  %410 = vst.msk [vmem:[#allocation2 + $0x20] sm:$0xff] %vm404_vm0, %v1494_v0  ;;  %s1666_s9 = sld [smem:[#allocation3 + $0x1a]]  ;;  %s1669_s10 = sld [smem:[#allocation3 + $0x1b]]  ;;  %vm1084_vm3 = vcmask 130048  }
  0x28   : > { %405 = vst.msk [vmem:[#allocation2] sm:$0xff] %vm404_vm0, %v1494_v0  ;;  %406 = vst.msk [vmem:[#allocation2 + $0x8] sm:$0xff] %vm404_vm0, %v1494_v0  ;;  %s179_s30 = scalar_select %p178_p11, %s1544_s16, 1 }
  0x29   : > { %411 = vst.msk [vmem:[#allocation2 + $0x28] sm:$0xf] %vm407_vm1, %v1494_v0  ;;  %408 = vst.msk [vmem:[#allocation2 + $0x10] sm:$0xf] %vm407_vm1, %v1494_v0  ;;  %s1672_s11 = sld [smem:[#allocation3]]  ;;  %s1674_s17 = sld [smem:[#allocation3 + $0x19]] }
  0x2a   : > { %s1338_s4 = sshll.u32 %s179_s30, 9  ;;  %s1677_s19 = sld [smem:[#allocation3 + $0x1c]] }
  0x2b   : > { %s1598_s7 = scalar_lea.vmem %s2196_s0, %s1338_s4  ;;  %s1680_s20 = sld [smem:[#allocation3 + $0x1d]] }
  0x2c   : > { %v183_v1 = vld [vmem:[%s1598_s7] sm:$0xff]  ;;  %v1222_v2 = vld [vmem:[%s1598_s7 + $0x10] sm:$0xff]  ;;  %v184_v19 = vld [vmem:[%s1598_s7 + $0x8] sm:$0xff]  ;;  %s1496_s24 = smov 127   ;;  %s1690_s25 = sld [smem:[#allocation3 + $0x1f]] }
  0x2d   : > { %v1224_v3 = vld [vmem:[%s1598_s7 + $0x20] sm:$0xff]  ;;  %v190_v4 = vmax.f32 %v183_v1, %v1222_v2  ;;  %v188_v5 = vadd.f32 %v1222_v2, %v183_v1  ;;  %v1226_v6 = vld [vmem:[%s1598_s7 + $0x30] sm:$0xff]  ;;  %v1223_v22 = vld [vmem:[%s1598_s7 + $0x18] sm:$0xff]  ;;  %s1497_s26 = smov 126   ;;  %s1697_s27 = sld [smem:[#allocation3 + $0x20]] }
  0x2e   : > { %v1228_v9 = vld [vmem:[%s1598_s7 + $0x40] sm:$0xff]  ;;  %v1230_v12 = vld [vmem:[%s1598_s7 + $0x50] sm:$0xff]  ;;  %v1225_v23 = vld [vmem:[%s1598_s7 + $0x28] sm:$0xff]  ;;  %v191_v25 = vmax.f32 %v184_v19, %v1223_v22  ;;  %v189_v26 = vadd.f32 %v1223_v22, %v184_v19  ;;  %s1498_s28 = smov 125   ;;  %s1704_s29 = sld [smem:[#allocation3 + $0x21]] }
  0x2f   : > { %v197_v7 = vmax.f32 %v190_v4, %v1224_v3  ;;  %v195_v8 = vadd.f32 %v1224_v3, %v188_v5  ;;  %v1232_v15 = vld [vmem:[%s1598_s7 + $0x60] sm:$0xff]  ;;  %v1234_v18 = vld [vmem:[%s1598_s7 + $0x70] sm:$0xff]  ;;  %v1227_v29 = vld [vmem:[%s1598_s7 + $0x38] sm:$0xff]  ;;  %s1499_s30 = smov 124   ;;  %s1710_s4 = sld [smem:[#allocation3 + $0x22]] }
  0x30   : > { %v1236_v24 = vld [vmem:[%s1598_s7 + $0x80] sm:$0xff]  ;;  %v1238_v30 = vld [vmem:[%s1598_s7 + $0x90] sm:$0xff]  ;;  %v198_v31 = vmax.f32 %v191_v25, %v1225_v23  ;;  %v196_v32 = vadd.f32 %v1225_v23, %v189_v26  ;;  %v1229_v35 = vld [vmem:[%s1598_s7 + $0x48] sm:$0xff]  ;;  %s1716_s5 = sld [smem:[#allocation3 + $0x24]]  ;;  %s1726_s6 = sld [smem:[#allocation3 + $0x25]] }
  0x31   : > { %v204_v10 = vmax.f32 %v197_v7, %v1226_v6  ;;  %v202_v11 = vadd.f32 %v1226_v6, %v195_v8  ;;  %v1240_v36 = vld [vmem:[%s1598_s7 + $0xa0] sm:$0xff]  ;;  %v1231_v41 = vld [vmem:[%s1598_s7 + $0x58] sm:$0xff]  ;;  %v1242_v42 = vld [vmem:[%s1598_s7 + $0xb0] sm:$0xff] }
  0x32   : > { %v205_v37 = vmax.f32 %v198_v31, %v1227_v29  ;;  %v203_v38 = vadd.f32 %v1227_v29, %v196_v32  ;;  %v1233_v47 = vld [vmem:[%s1598_s7 + $0x68] sm:$0xff]  ;;  %v1244_v48 = vld [vmem:[%s1598_s7 + $0xc0] sm:$0xff]  ;;  %v1235_v53 = vld [vmem:[%s1598_s7 + $0x78] sm:$0xff] }
  0x33   : > { %v211_v13 = vmax.f32 %v204_v10, %v1228_v9  ;;  %v209_v14 = vadd.f32 %v1228_v9, %v202_v11  ;;  %v1246_v54 = vld [vmem:[%s1598_s7 + $0xd0] sm:$0xff]  ;;  %v1237_v59 = vld [vmem:[%s1598_s7 + $0x88] sm:$0xff]  ;;  %v1248_v60 = vld [vmem:[%s1598_s7 + $0xe0] sm:$0xff] }
  0x34   : > { %v212_v43 = vmax.f32 %v205_v37, %v1229_v35  ;;  %v210_v44 = vadd.f32 %v1229_v35, %v203_v38  ;;  %v1239_v2 = vld [vmem:[%s1598_s7 + $0x98] sm:$0xff]  ;;  %v1250_v3 = vld [vmem:[%s1598_s7 + $0xf0] sm:$0xff]  ;;  %v1241_v8 = vld [vmem:[%s1598_s7 + $0xa8] sm:$0xff] }
  0x35   : > { %v218_v16 = vmax.f32 %v211_v13, %v1230_v12  ;;  %v216_v17 = vadd.f32 %v1230_v12, %v209_v14  ;;  %v1252_v9 = vld [vmem:[%s1598_s7 + $0x100] sm:$0xff]  ;;  %v1243_v14 = vld [vmem:[%s1598_s7 + $0xb8] sm:$0xff]  ;;  %v1249_v32 = vld [vmem:[%s1598_s7 + $0xe8] sm:$0xff] }
  0x36   : > { %v219_v49 = vmax.f32 %v212_v43, %v1231_v41  ;;  %v217_v50 = vadd.f32 %v1231_v41, %v210_v44  ;;  %v1247_v26 = vld [vmem:[%s1598_s7 + $0xd8] sm:$0xff]  ;;  %v1253_v44 = vld [vmem:[%s1598_s7 + $0x108] sm:$0xff] }
  0x37   : > { %v225_v20 = vmax.f32 %v218_v16, %v1232_v15  ;;  %v223_v21 = vadd.f32 %v1232_v15, %v216_v17  ;;  %v1254_v15 = vld [vmem:[%s1598_s7 + $0x110] sm:$0xff]  ;;  %v1251_v38 = vld [vmem:[%s1598_s7 + $0xf8] sm:$0xff] }
  0x38   : > { %v226_v55 = vmax.f32 %v219_v49, %v1233_v47  ;;  %v224_v56 = vadd.f32 %v1233_v47, %v217_v50  ;;  %v1255_v50 = vld [vmem:[%s1598_s7 + $0x118] sm:$0xff] }
  0x39   : > { %v232_v27 = vmax.f32 %v225_v20, %v1234_v18  ;;  %v230_v28 = vadd.f32 %v1234_v18, %v223_v21  ;;  %v1245_v20 = vld [vmem:[%s1598_s7 + $0xc8] sm:$0xff]  ;;  %v1256_v21 = vld [vmem:[%s1598_s7 + $0x120] sm:$0xff] }
  0x3a   : > { %v233_v61 = vmax.f32 %v226_v55, %v1235_v53  ;;  %v231_v62 = vadd.f32 %v1235_v53, %v224_v56  ;;  %v1257_v56 = vld [vmem:[%s1598_s7 + $0x128] sm:$0xff] }
  0x3b   : > { %v239_v33 = vmax.f32 %v232_v27, %v1236_v24  ;;  %v237_v34 = vadd.f32 %v1236_v24, %v230_v28  ;;  %v1258_v27 = vld [vmem:[%s1598_s7 + $0x130] sm:$0xff] }
  0x3c   : > { %v240_v4 = vmax.f32 %v233_v61, %v1237_v59  ;;  %v238_v5 = vadd.f32 %v1237_v59, %v231_v62  ;;  %v1259_v62 = vld [vmem:[%s1598_s7 + $0x138] sm:$0xff] }
  0x3d   : > { %v246_v39 = vmax.f32 %v239_v33, %v1238_v30  ;;  %v244_v40 = vadd.f32 %v1238_v30, %v237_v34  ;;  %v1260_v33 = vld [vmem:[%s1598_s7 + $0x140] sm:$0xff] }
  0x3e   : > { %v247_v10 = vmax.f32 %v240_v4, %v1239_v2  ;;  %v245_v11 = vadd.f32 %v1239_v2, %v238_v5  ;;  %v1261_v5 = vld [vmem:[%s1598_s7 + $0x148] sm:$0xff] }
  0x3f   : > { %v253_v45 = vmax.f32 %v246_v39, %v1240_v36  ;;  %v251_v46 = vadd.f32 %v1240_v36, %v244_v40  ;;  %v1262_v39 = vld [vmem:[%s1598_s7 + $0x150] sm:$0xff] }
  0x40   : > { %v254_v16 = vmax.f32 %v247_v10, %v1241_v8  ;;  %v252_v17 = vadd.f32 %v1241_v8, %v245_v11  ;;  %v1263_v11 = vld [vmem:[%s1598_s7 + $0x158] sm:$0xff] }
  0x41   : > { %v260_v51 = vmax.f32 %v253_v45, %v1242_v42  ;;  %v258_v52 = vadd.f32 %v1242_v42, %v251_v46  ;;  %v1264_v45 = vld [vmem:[%s1598_s7 + $0x160] sm:$0xff] }
  0x42   : > { %v261_v22 = vmax.f32 %v254_v16, %v1243_v14  ;;  %v259_v23 = vadd.f32 %v1243_v14, %v252_v17  ;;  %v1265_v17 = vld [vmem:[%s1598_s7 + $0x168] sm:$0xff] }
  0x43   : > { %v267_v57 = vmax.f32 %v260_v51, %v1244_v48  ;;  %v265_v58 = vadd.f32 %v1244_v48, %v258_v52  ;;  %v1266_v51 = vld [vmem:[%s1598_s7 + $0x170] sm:$0xff] }
  0x44   : > { %v268_v28 = vmax.f32 %v261_v22, %v1245_v20  ;;  %v266_v29 = vadd.f32 %v1245_v20, %v259_v23  ;;  %v1267_v23 = vld [vmem:[%s1598_s7 + $0x178] sm:$0xff] }
  0x45   : > { %v274_v63 = vmax.f32 %v267_v57, %v1246_v54  ;;  %v272_v1 = vadd.f32 %v1246_v54, %v265_v58  ;;  %v1268_v57 = vld [vmem:[%s1598_s7 + $0x180] sm:$0xff] }
  0x46   : > { %v275_v34 = vmax.f32 %v268_v28, %v1247_v26  ;;  %v273_v35 = vadd.f32 %v1247_v26, %v266_v29  ;;  %v1269_v29 = vld [vmem:[%s1598_s7 + $0x188] sm:$0xff] }
  0x47   : > { %v281_v6 = vmax.f32 %v274_v63, %v1248_v60  ;;  %v279_v7 = vadd.f32 %v1248_v60, %v272_v1  ;;  %v1270_v63 = vld [vmem:[%s1598_s7 + $0x190] sm:$0xff] }
  0x48   : > { %v282_v40 = vmax.f32 %v275_v34, %v1249_v32  ;;  %v280_v41 = vadd.f32 %v1249_v32, %v273_v35  ;;  %v1271_v35 = vld [vmem:[%s1598_s7 + $0x198] sm:$0xff] }
  0x49   : > { %v288_v12 = vmax.f32 %v281_v6, %v1250_v3  ;;  %v286_v13 = vadd.f32 %v1250_v3, %v279_v7  ;;  %v1272_v6 = vld [vmem:[%s1598_s7 + $0x1a0] sm:$0xff] }
  0x4a   : > { %v289_v46 = vmax.f32 %v282_v40, %v1251_v38  ;;  %v287_v47 = vadd.f32 %v1251_v38, %v280_v41  ;;  %v1273_v40 = vld [vmem:[%s1598_s7 + $0x1a8] sm:$0xff] }
  0x4b   : > { %v295_v18 = vmax.f32 %v288_v12, %v1252_v9  ;;  %v293_v19 = vadd.f32 %v1252_v9, %v286_v13  ;;  %v1274_v12 = vld [vmem:[%s1598_s7 + $0x1b0] sm:$0xff] }
  0x4c   : > { %v296_v52 = vmax.f32 %v289_v46, %v1253_v44  ;;  %v294_v53 = vadd.f32 %v1253_v44, %v287_v47 }
  0x4d   : > { %v302_v24 = vmax.f32 %v295_v18, %v1254_v15  ;;  %v300_v25 = vadd.f32 %v1254_v15, %v293_v19  ;;  %v1276_v18 = vld [vmem:[%s1598_s7 + $0x1c0] sm:$0xff] }
  0x4e   : > { %v303_v58 = vmax.f32 %v296_v52, %v1255_v50  ;;  %v301_v59 = vadd.f32 %v1255_v50, %v294_v53  ;;  %v1279_v52 = vld [vmem:[%s1598_s7 + $0x1d8] sm:$0xff] }
  0x4f   : > { %v309_v30 = vmax.f32 %v302_v24, %v1256_v21  ;;  %v307_v31 = vadd.f32 %v1256_v21, %v300_v25  ;;  %v1278_v24 = vld [vmem:[%s1598_s7 + $0x1d0] sm:$0xff] }
  0x50   : > { %v310_v1 = vmax.f32 %v303_v58, %v1257_v56  ;;  %v308_v2 = vadd.f32 %v1257_v56, %v301_v59  ;;  %v1283_v58 = vld [vmem:[%s1598_s7 + $0x1f8] sm:$0xff] }
  0x51   : > { %v316_v36 = vmax.f32 %v309_v30, %v1258_v27  ;;  %v314_v37 = vadd.f32 %v1258_v27, %v307_v31  ;;  %v1280_v30 = vld [vmem:[%s1598_s7 + $0x1e0] sm:$0xff] }
  0x52   : > { %v317_v7 = vmax.f32 %v310_v1, %v1259_v62  ;;  %v315_v8 = vadd.f32 %v1259_v62, %v308_v2 }
  0x53   : > { %v323_v42 = vmax.f32 %v316_v36, %v1260_v33  ;;  %v321_v43 = vadd.f32 %v1260_v33, %v314_v37  ;;  %v1282_v36 = vld [vmem:[%s1598_s7 + $0x1f0] sm:$0xff] }
  0x54   : > { %v324_v13 = vmax.f32 %v317_v7, %v1261_v5  ;;  %v322_v14 = vadd.f32 %v1261_v5, %v315_v8 }
  0x55   : > { %v330_v48 = vmax.f32 %v323_v42, %v1262_v39  ;;  %v328_v49 = vadd.f32 %v1262_v39, %v321_v43 }
  0x56   : > { %v331_v19 = vmax.f32 %v324_v13, %v1263_v11  ;;  %v329_v20 = vadd.f32 %v1263_v11, %v322_v14  ;;  %v521_v13 = vstv %s1677_s19  ;;  %s1784_s19 = sld [smem:[#allocation3 + $0x2]] }
  0x57   : > { %v337_v54 = vmax.f32 %v330_v48, %v1264_v45  ;;  %v335_v55 = vadd.f32 %v1264_v45, %v328_v49  ;;  %v1275_v45 = vld [vmem:[%s1598_s7 + $0x1b8] sm:$0xff]  ;;  %v1277_v49 = vld [vmem:[%s1598_s7 + $0x1c8] sm:$0xff] }
  0x58   : > { %v338_v25 = vmax.f32 %v331_v19, %v1265_v17  ;;  %v336_v26 = vadd.f32 %v1265_v17, %v329_v20 }
  0x59   : > { %v344_v60 = vmax.f32 %v337_v54, %v1266_v51  ;;  %v342_v61 = vadd.f32 %v1266_v51, %v335_v55  ;;  %v1281_v55 = vld [vmem:[%s1598_s7 + $0x1e8] sm:$0xff]  ;;  %s1738_s7 = sld [smem:[#allocation3 + $0x26]] }
  0x5a   : > { %v345_v31 = vmax.f32 %v338_v25, %v1267_v23  ;;  %v343_v32 = vadd.f32 %v1267_v23, %v336_v26  ;;  %v593_v23 = vstv %s1690_s25  ;;  %v621_v26 = vstv %s1697_s27  ;;  %s1800_s25 = sld [smem:[#allocation3 + $0x4]] }
  0x5b   : > { %v351_v3 = vmax.f32 %v344_v60, %v1268_v57  ;;  %v349_v4 = vadd.f32 %v1268_v57, %v342_v61  ;;  %s1807_s27 = sld [smem:[#allocation3 + $0x2c]] }
  0x5c   : > { %v352_v37 = vmax.f32 %v345_v31, %v1269_v29  ;;  %v350_v38 = vadd.f32 %v1269_v29, %v343_v32  ;;  %v649_v29 = vstv %s1704_s29  ;;  %s1814_s29 = sld [smem:[#allocation3 + $0x6]] }
  0x5d   : > { %v358_v9 = vmax.f32 %v351_v3, %v1270_v63  ;;  %v356_v10 = vadd.f32 %v1270_v63, %v349_v4  ;;  %v465_v3 = vstv %s1666_s9  ;;  %s1752_s9 = sld [smem:[#allocation3 + $0x29]] }
  0x5e   : > { %v359_v41 = vmax.f32 %v352_v37, %v1271_v35  ;;  %v357_v42 = vadd.f32 %v1271_v35, %v350_v38 }
  0x5f   : > { %v365_v15 = vmax.f32 %v358_v9, %v1272_v6  ;;  %v363_v16 = vadd.f32 %v1272_v6, %v356_v10  ;;  %v493_v6 = vstv %s1669_s10  ;;  %v438_v9 = vstv %s1672_s11  ;;  %s1761_s10 = sld [smem:[#allocation3 + $0x2a]]  ;;  %s1770_s11 = sld [smem:[#allocation3 + $0x2b]] }
  0x60   : > { %v366_v46 = vmax.f32 %v359_v41, %v1273_v40  ;;  %v364_v47 = vadd.f32 %v1273_v40, %v357_v42  ;;  %v445_v10 = vstv %s1674_s17  ;;  %v721_v40 = vstv %s1716_s5  ;;  %s1774_s17 = sld [smem:[#allocation3 + $0x1]]  ;;  %s1830_s5 = sld [smem:[#allocation3 + $0x8]] }
  0x61   : > { %v372_v21 = vmax.f32 %v365_v15, %v1274_v12  ;;  %v370_v22 = vadd.f32 %v1274_v12, %v363_v16 }
  0x62   : > { %v373_v50 = vmax.f32 %v366_v46, %v1275_v45  ;;  %v371_v51 = vadd.f32 %v1275_v45, %v364_v47  ;;  %v777_v46 = vstv %s1738_s7  ;;  %s1844_s7 = sld [smem:[#allocation3 + $0x2e]] }
  0x63   : > { %v379_v27 = vmax.f32 %v372_v21, %v1276_v18  ;;  %v377_v28 = vadd.f32 %v1276_v18, %v370_v22  ;;  %v549_v18 = vstv %s1680_s20  ;;  %s1793_s20 = sld [smem:[#allocation3 + $0x3]] }
  0x64   : > { %v380_v53 = vmax.f32 %v373_v50, %v1277_v49  ;;  %v378_v54 = vadd.f32 %v1277_v49, %v371_v51 }
  0x65   : > { %v386_v33 = vmax.f32 %v379_v27, %v1278_v24  ;;  %v384_v34 = vadd.f32 %v1278_v24, %v377_v28 }
  0x66   : > { %v387_v56 = vmax.f32 %v380_v53, %v1279_v52  ;;  %v385_v57 = vadd.f32 %v1279_v52, %v378_v54  ;;  %v849_v54 = vstv %s1752_s9  ;;  %s1862_s9 = sld [smem:[#allocation3 + $0xc]] }
  0x67   : > { %v393_v39 = vmax.f32 %v386_v33, %v1280_v30  ;;  %v391_v0 = vadd.f32 %v1280_v30, %v384_v34  ;;  %v677_v34 = vstv %s1710_s4  ;;  %s1821_s4 = sld [smem:[#allocation3 + $0x7]] }
  0x68   : > { %v394_v59 = vmax.f32 %v387_v56, %v1281_v55  ;;  %v392_v60 = vadd.f32 %v1281_v55, %v385_v57  ;;  %v877_v57 = vstv %s1761_s10  ;;  %s1871_s10 = sld [smem:[#allocation3 + $0xd]] }
  0x69   : > { %v400_v43 = vmax.f32 %v393_v39, %v1282_v36  ;;  %v398_v44 = vadd.f32 %v1282_v36, %v391_v0 }
  0x6a   : > { %v401_v61 = vmax.f32 %v394_v59, %v1283_v58  ;;  %v399_v62 = vadd.f32 %v1283_v58, %v392_v60  ;;  %v905_v60 = vstv %s1770_s11  ;;  %s1878_s11 = sld [smem:[#allocation3 + $0xe]] }
  0x6b   : > { %425 = vrot.lane.b32.xlu1 %v400_v43, %s1495_s8  ;;  %v402_v48 = vmul.f32 0.03125, %v398_v44  ;;  %v749_v43 = vstv %s1726_s6  ;;  %s1837_s6 = sld [smem:[#allocation3 + $0x9]] }
  0x6c   : > { %v403_v63 = vmul.f32 0.03125, %v399_v62  ;;  %v452_v62 = vstv %s1774_s17  ;;  %s1887_s17 = sld [smem:[#allocation3 + $0x2f]] }
  0x6d   : > { %414 = vrot.lane.b32.xlu0 %v402_v48, %s1495_s8 }
  0x6f   : > { %427 = vrot.lane.b32.xlu1 %v401_v61, %s1495_s8 }
  0x71   : > { %416 = vrot.lane.b32.xlu0 %v403_v63, %s1495_s8  ;;  %s1745_s8 = sld [smem:[#allocation3 + $0x27]] }
  0x77   : > { %v805_v50 = vstv %s1745_s8  ;;  %s1853_s8 = sld [smem:[#allocation3 + $0xb]] }
  0xdd   : > { %v426_v1 = vpop.permute.xlu1 %425 }
  0xde   : > { %432 = vst.msk [vmem:[#allocation2 + $0x1a] sm:$0xff] %vm420_vm2, %v426_v1 }
  0xdf   : > { %v415_v2 = vpop.permute.xlu0 %414 }
  0xe0   : > { %421 = vst.msk [vmem:[#allocation2 + $0x2] sm:$0xff] %vm420_vm2, %v415_v2 }
  0xe1   : > { %v428_v7 = vpop.permute.xlu1 %427 }
  0xe2   : > { %433 = vst.msk [vmem:[#allocation2 + $0x22] sm:$0xff] %vm420_vm2, %v428_v7  ;;  %v508_v7 = vstv %s1793_s20  ;;  %s1903_s20 = sld [smem:[#allocation3 + $0x11]] }
  0xe3   : > { %v417_v11 = vpop.permute.xlu0 %416 }
  0xe4   : > { %422 = vst.msk [vmem:[#allocation2 + $0xa] sm:$0xff] %vm420_vm2, %v417_v11  ;;  %v536_v11 = vstv %s1800_s25  ;;  %s1914_s25 = sld [smem:[#allocation3 + $0x12]] }
  0xe5   : > { %v443_v4 = vld [vmem:[#allocation2 + $0x18] sm:$0xff] }
  0xe6   : > { %v466_v5 = vmul.f32 %v465_v3, %v443_v4  ;;  %v494_v12 = vmul.f32 %v493_v6, %v443_v4  ;;  %v446_v15 = vmul.f32 %v445_v10, %v443_v4  ;;  %v522_v16 = vmul.f32 %v521_v13, %v443_v4  ;;  %v1701_v22 = vld [vmem:[#allocation2 + $0x19] sm:$0xff] }
  0xe7   : > { %v1684_v8 = vld [vmem:[#allocation2] sm:$0xff]  ;;  %v550_v21 = vmul.f32 %v549_v18, %v443_v4  ;;  %v594_v25 = vmul.f32 %v593_v23, %v1701_v22  ;;  %v622_v28 = vmul.f32 %v621_v26, %v1701_v22  ;;  %v650_v33 = vmul.f32 %v649_v29, %v1701_v22 }
  0xe8   : > { %470 = vrot.lane.b32.xlu0 %v466_v5, %s1496_s24  ;;  %v439_v14 = vmul.f32 %v438_v9, %v1684_v8  ;;  %v678_v39 = vmul.f32 %v677_v34, %v1701_v22  ;;  %v1735_v0 = vld [vmem:[#allocation2 + $0x1a] sm:$0xff]  ;;  %v453_v2 = vmul.f32 %v452_v62, %v1684_v8  ;;  %v480_v4 = vstv %s1784_s19  ;;  %s1896_s19 = sld [smem:[#allocation3 + $0x10]] }
  0xe9   : > { %v444_v19 = vld [vmem:[#allocation2 + $0x20] sm:$0xff]  ;;  %v722_v42 = vmul.f32 %v721_v40, %v1735_v0  ;;  %v750_v45 = vmul.f32 %v749_v43, %v1735_v0  ;;  %v778_v49 = vmul.f32 %v777_v46, %v1735_v0  ;;  %v806_v52 = vmul.f32 %v805_v50, %v1735_v0 }
  0xea   : > { %v1694_v17 = vadd.f32 %v446_v15, %v439_v14  ;;  %v467_v20 = vmul.f32 %v465_v3, %v444_v19  ;;  %v495_v24 = vmul.f32 %v493_v6, %v444_v19  ;;  %v523_v27 = vmul.f32 %v521_v13, %v444_v19  ;;  %v1721_v32 = vld [vmem:[#allocation2 + $0x21] sm:$0xff] }
  0xeb   : > { %v1719_v30 = vld [vmem:[#allocation2 + $0x8] sm:$0xff]  ;;  %v551_v31 = vmul.f32 %v549_v18, %v444_v19  ;;  %v447_v35 = vmul.f32 %v445_v10, %v444_v19  ;;  %v595_v37 = vmul.f32 %v593_v23, %v1721_v32  ;;  %v623_v41 = vmul.f32 %v621_v26, %v1721_v32  ;;  %v1767_v53 = vld [vmem:[#allocation2 + $0x1b] sm:$0xff] }
  0xec   : > { %498 = vrot.lane.b32.xlu0 %v494_v12, %s1497_s26  ;;  %472 = vrot.lane.b32.xlu1 %v467_v20, %s1496_s24  ;;  %v440_v36 = vmul.f32 %v438_v9, %v1719_v30  ;;  %v651_v44 = vmul.f32 %v649_v29, %v1721_v32  ;;  %v679_v47 = vmul.f32 %v677_v34, %v1721_v32  ;;  %v1756_v48 = vld [vmem:[#allocation2 + $0x22] sm:$0xff]  ;;  %v933_v14 = vstv %s1807_s27  ;;  %s1923_s27 = sld [smem:[#allocation3 + $0x13]] }
  0xed   : > { %v723_v51 = vmul.f32 %v721_v40, %v1756_v48  ;;  %v751_v55 = vmul.f32 %v749_v43, %v1756_v48  ;;  %v850_v56 = vmul.f32 %v849_v54, %v1767_v53  ;;  %v779_v58 = vmul.f32 %v777_v46, %v1756_v48  ;;  %v1789_v63 = vld [vmem:[#allocation2 + $0x23] sm:$0xff] }
  0xee   : > { %v1731_v38 = vadd.f32 %v447_v35, %v440_v36  ;;  %v878_v59 = vmul.f32 %v877_v57, %v1767_v53  ;;  %v807_v61 = vmul.f32 %v805_v50, %v1756_v48  ;;  %v906_v1 = vmul.f32 %v905_v60, %v1767_v53  ;;  %v1827_v18 = vld [vmem:[#allocation2 + $0x1] sm:$0xff] }
  0xef   : > { %v851_v3 = vmul.f32 %v849_v54, %v1789_v63  ;;  %v879_v5 = vmul.f32 %v877_v57, %v1789_v63  ;;  %v481_v6 = vmul.f32 %v480_v4, %v1684_v8  ;;  %v907_v9 = vmul.f32 %v905_v60, %v1789_v63 }
  0xf0   : > { %526 = vrot.lane.b32.xlu0 %v522_v16, %s1498_s28  ;;  %500 = vrot.lane.b32.xlu1 %v495_v24, %s1497_s26  ;;  %v509_v10 = vmul.f32 %v508_v7, %v1684_v8  ;;  %v454_v12 = vmul.f32 %v452_v62, %v1719_v30  ;;  %v537_v13 = vmul.f32 %v536_v11, %v1684_v8  ;;  %v580_v19 = vstv %s1814_s29  ;;  %s1932_s29 = sld [smem:[#allocation3 + $0x30]] }
  0xf1   : > { %v482_v15 = vmul.f32 %v480_v4, %v1719_v30  ;;  %v934_v16 = vmul.f32 %v933_v14, %v1767_v53  ;;  %v510_v8 = vmul.f32 %v508_v7, %v1719_v30  ;;  %v581_v20 = vmul.f32 %v580_v19, %v1827_v18 }
  0xf2   : > { %v538_v23 = vmul.f32 %v536_v11, %v1719_v30  ;;  %v935_v26 = vmul.f32 %v933_v14, %v1789_v63  ;;  %v664_v29 = vstv %s1837_s6  ;;  %v977_v34 = vstv %s1844_s7  ;;  %s1969_s6 = sld [smem:[#allocation3 + $0x17]]  ;;  %s1980_s7 = sld [smem:[#allocation3 + $0x18]] }
  0xf3   : > { %v764_v46 = vstv %s1871_s10  ;;  %v836_v60 = vstv %s1896_s19  ;;  %s2096_s10 = sld [smem:[#allocation3 + $0x28]] }
  0xf4   : > { %554 = vrot.lane.b32.xlu0 %v550_v21, %s1499_s30  ;;  %528 = vrot.lane.b32.xlu1 %v523_v27, %s1498_s28  ;;  %v608_v21 = vstv %s1821_s4  ;;  %v1848_v27 = vld [vmem:[#allocation2 + $0x9] sm:$0xff]  ;;  %s1945_s4 = sld [smem:[#allocation3 + $0x15]] }
  0xf5   : > { %v609_v24 = vmul.f32 %v608_v21, %v1827_v18  ;;  %v582_v30 = vmul.f32 %v580_v19, %v1848_v27  ;;  %v610_v35 = vmul.f32 %v608_v21, %v1848_v27  ;;  %v666_v43 = vmul.f32 %v664_v29, %v1848_v27 }
  0xf8   : > { %598 = vrot.lane.b32.xlu0 %v594_v25, %s1496_s24  ;;  %556 = vrot.lane.b32.xlu1 %v551_v31, %s1499_s30  ;;  %v636_v25 = vstv %s1830_s5  ;;  %v665_v31 = vmul.f32 %v664_v29, %v1827_v18  ;;  %s1956_s5 = sld [smem:[#allocation3 + $0x16]] }
  0xf9   : > { %v638_v40 = vmul.f32 %v636_v25, %v1848_v27 }
  0xfc   : > { %626 = vrot.lane.b32.xlu0 %v622_v28, %s1497_s26  ;;  %600 = vrot.lane.b32.xlu1 %v595_v37, %s1496_s24  ;;  %v637_v28 = vmul.f32 %v636_v25, %v1827_v18  ;;  %v1868_v37 = vld [vmem:[#allocation2 + $0x2] sm:$0xff] }
  0xfd   : > { %v765_v50 = vmul.f32 %v764_v46, %v1868_v37  ;;  %v1966_v25 = vld [vmem:[#allocation2 + $0x4] sm:$0xff] }
 0x100   : > { %654 = vrot.lane.b32.xlu0 %v650_v33, %s1498_s28  ;;  %628 = vrot.lane.b32.xlu1 %v623_v41, %s1497_s26  ;;  %v1859_v33 = vld [vmem:[#allocation2 + $0x1c] sm:$0xff] }
 0x101   : > { %v978_v36 = vmul.f32 %v977_v34, %v1859_v33 }
 0x104   : > { %682 = vrot.lane.b32.xlu0 %v678_v39, %s1499_s30  ;;  %656 = vrot.lane.b32.xlu1 %v651_v44, %s1498_s28  ;;  %v708_v39 = vstv %s1853_s8  ;;  %v1882_v44 = vld [vmem:[#allocation2 + $0x24] sm:$0xff]  ;;  %s1991_s8 = sld [smem:[#allocation3 + $0x31]] }
 0x105   : > { %v709_v41 = vmul.f32 %v708_v39, %v1868_v37 }
 0x108   : > { %726 = vrot.lane.b32.xlu0 %v722_v42, %s1496_s24  ;;  %684 = vrot.lane.b32.xlu1 %v679_v47, %s1499_s30  ;;  %v736_v42 = vstv %s1862_s9  ;;  %v979_v47 = vmul.f32 %v977_v34, %v1882_v44  ;;  %v992_v34 = vstv %s1956_s5  ;;  %s2092_s9 = sld [smem:[#allocation3 + $0xf]]  ;;  %s175_s5 = sand.u32 1, %s1483_s13  }
 0x10c   : > { %754 = vrot.lane.b32.xlu0 %v750_v45, %s1497_s26  ;;  %728 = vrot.lane.b32.xlu1 %v723_v51, %s1496_s24  ;;  %v737_v45 = vmul.f32 %v736_v42, %v1868_v37  ;;  %v792_v51 = vstv %s1878_s11  ;;  %s2112_s11 = sld [smem:[#allocation3 + $0x14]] }
 0x10d   : > { %v793_v54 = vmul.f32 %v792_v51, %v1868_v37 }
 0x110   : > { %782 = vrot.lane.b32.xlu0 %v778_v49, %s1498_s28  ;;  %756 = vrot.lane.b32.xlu1 %v751_v55, %s1497_s26  ;;  %v1891_v49 = vld [vmem:[#allocation2 + $0xa] sm:$0xff]  ;;  %v1005_v55 = vstv %s1887_s17  ;;  %s2116_s17 = sld [smem:[#allocation3 + $0x2d]] }
 0x114   : > { %810 = vrot.lane.b32.xlu0 %v806_v52, %s1499_s30  ;;  %784 = vrot.lane.b32.xlu1 %v779_v58, %s1498_s28  ;;  %v710_v52 = vmul.f32 %v708_v39, %v1891_v49  ;;  %v1006_v58 = vmul.f32 %v1005_v55, %v1859_v33 }
 0x118   : > { %854 = vrot.lane.b32.xlu0 %v850_v56, %s1496_s24  ;;  %812 = vrot.lane.b32.xlu1 %v807_v61, %s1499_s30  ;;  %v738_v56 = vmul.f32 %v736_v42, %v1891_v49  ;;  %v766_v61 = vmul.f32 %v764_v46, %v1891_v49 }
 0x11c   : > { %882 = vrot.lane.b32.xlu0 %v878_v59, %s1497_s26  ;;  %856 = vrot.lane.b32.xlu1 %v851_v3, %s1496_s24  ;;  %v1911_v59 = vld [vmem:[#allocation2 + $0x3] sm:$0xff]  ;;  %v794_v3 = vmul.f32 %v792_v51, %v1891_v49 }
 0x120   : > { %910 = vrot.lane.b32.xlu0 %v906_v1, %s1498_s28  ;;  %884 = vrot.lane.b32.xlu1 %v879_v5, %s1497_s26  ;;  %v837_v1 = vmul.f32 %v836_v60, %v1911_v59 }
 0x124   : > { %457 = vrot.lane.b32.xlu0 %v453_v2, %s1496_s24  ;;  %912 = vrot.lane.b32.xlu1 %v907_v9, %s1498_s28  ;;  %v864_v2 = vstv %s1903_s20  ;;  %v1007_v9 = vmul.f32 %v1005_v55, %v1882_v44 }
 0x125   : > { %v865_v5 = vmul.f32 %v864_v2, %v1911_v59 }
 0x128   : > { %485 = vrot.lane.b32.xlu0 %v481_v6, %s1497_s26  ;;  %459 = vrot.lane.b32.xlu1 %v454_v12, %s1496_s24  ;;  %v892_v6 = vstv %s1914_s25 }
 0x129   : > { %v893_v12 = vmul.f32 %v892_v6, %v1911_v59 }
 0x12c   : > { %513 = vrot.lane.b32.xlu0 %v509_v10, %s1498_s28  ;;  %487 = vrot.lane.b32.xlu1 %v482_v15, %s1497_s26  ;;  %v1938_v10 = vld [vmem:[#allocation2 + $0xb] sm:$0xff] }
 0x12d   : > { %v838_v15 = vmul.f32 %v836_v60, %v1938_v10  ;;  %v866_v21 = vmul.f32 %v864_v2, %v1938_v10  ;;  %v894_v29 = vmul.f32 %v892_v6, %v1938_v10 }
 0x130   : > { %541 = vrot.lane.b32.xlu0 %v537_v13, %s1499_s30  ;;  %515 = vrot.lane.b32.xlu1 %v510_v8, %s1498_s28  ;;  %v920_v13 = vstv %s1923_s27  ;;  %v1033_v8 = vstv %s1932_s29 }
 0x131   : > { %v921_v19 = vmul.f32 %v920_v13, %v1911_v59 }
 0x134   : > { %938 = vrot.lane.b32.xlu0 %v934_v16, %s1499_s30  ;;  %543 = vrot.lane.b32.xlu1 %v538_v23, %s1499_s30 }
 0x138   : > { %585 = vrot.lane.b32.xlu0 %v581_v20, %s1496_s24  ;;  %940 = vrot.lane.b32.xlu1 %v935_v26, %s1499_s30  ;;  %v964_v26 = vstv %s1945_s4 }
 0x13c   : > { %613 = vrot.lane.b32.xlu0 %v609_v24, %s1497_s26  ;;  %587 = vrot.lane.b32.xlu1 %v582_v30, %s1496_s24  ;;  %v1034_v24 = vmul.f32 %v1033_v8, %v1859_v33 }
 0x140   : > { %641 = vrot.lane.b32.xlu0 %v637_v28, %s1498_s28  ;;  %615 = vrot.lane.b32.xlu1 %v610_v35, %s1497_s26 }
 0x144   : > { %669 = vrot.lane.b32.xlu0 %v665_v31, %s1499_s30  ;;  %643 = vrot.lane.b32.xlu1 %v638_v40, %s1498_s28  ;;  %v965_v31 = vmul.f32 %v964_v26, %v1966_v25  ;;  %v993_v40 = vmul.f32 %v992_v34, %v1966_v25 }
 0x148   : > { %982 = vrot.lane.b32.xlu0 %v978_v36, %s1496_s24  ;;  %671 = vrot.lane.b32.xlu1 %v666_v43, %s1499_s30  ;;  %v922_v36 = vmul.f32 %v920_v13, %v1938_v10  ;;  %v1035_v43 = vmul.f32 %v1033_v8, %v1882_v44 }
 0x14c   : > { %713 = vrot.lane.b32.xlu0 %v709_v41, %s1496_s24  ;;  %984 = vrot.lane.b32.xlu1 %v979_v47, %s1496_s24  ;;  %v1020_v41 = vstv %s1969_s6  ;;  %s1219_s6 = sshll.u32 %s175_s5, 4 }
 0x14d   : > { %v1021_v47 = vmul.f32 %v1020_v41, %v1966_v25 }
 0x150   : > { %741 = vrot.lane.b32.xlu0 %v737_v45, %s1497_s26  ;;  %715 = vrot.lane.b32.xlu1 %v710_v52, %s1496_s24  ;;  %v1997_v45 = vld [vmem:[#allocation2 + $0xc] sm:$0xff] }
 0x151   : > { %v966_v52 = vmul.f32 %v964_v26, %v1997_v45  ;;  %v994_v60 = vmul.f32 %v992_v34, %v1997_v45 }
 0x154   : > { %769 = vrot.lane.b32.xlu0 %v765_v50, %s1498_s28  ;;  %743 = vrot.lane.b32.xlu1 %v738_v56, %s1497_s26  ;;  %v1048_v50 = vstv %s1980_s7  ;;  %v1061_v56 = vstv %s1991_s8  ;;  %s177_s7 = scalar_lea.vmem [#allocation6], %s1219_s6 }
 0x155   : > { %v1049_v55 = vmul.f32 %v1048_v50, %v1966_v25  ;;  %s1139_s8 = sshll.u32 %s177_s7, 4  ;;  %s2146_s8 = int_to_ptr.vmem [resolvable:$true] %s1139_s8 }
 0x158   : > { %797 = vrot.lane.b32.xlu0 %v793_v54, %s1499_s30  ;;  %771 = vrot.lane.b32.xlu1 %v766_v61, %s1498_s28 }
 0x15a   : > { %v1907_v57 = vpop.permute.xlu0 %470 }
 0x15c   : > { %1010 = vrot.lane.b32.xlu0 %v1006_v58, %s1497_s26  ;;  %799 = vrot.lane.b32.xlu1 %v794_v3, %s1499_s30  ;;  %v1022_v3 = vmul.f32 %v1020_v41, %v1997_v45 }
 0x15e   : > { %v1918_v62 = vpop.permute.xlu0 %498  ;;  %v1935_v7 = vpop.permute.xlu1 %472 }
 0x160   : > { %841 = vrot.lane.b32.xlu0 %v837_v1, %s1496_s24  ;;  %1012 = vrot.lane.b32.xlu1 %v1007_v9, %s1497_s26  ;;  %v1062_v1 = vmul.f32 %v1061_v56, %v1859_v33  ;;  %v1050_v9 = vmul.f32 %v1048_v50, %v1997_v45 }
 0x162   : > { %v1927_v4 = vpop.permute.xlu0 %526  ;;  %v1948_v14 = vpop.permute.xlu1 %500 }
 0x164   : > { %869 = vrot.lane.b32.xlu0 %v865_v5, %s1497_s26  ;;  %843 = vrot.lane.b32.xlu1 %v838_v15, %s1496_s24  ;;  %v1063_v15 = vmul.f32 %v1061_v56, %v1882_v44 }
 0x166   : > { %v1940_v11 = vpop.permute.xlu0 %554  ;;  %v1959_v20 = vpop.permute.xlu1 %528 }
 0x168   : > { %897 = vrot.lane.b32.xlu0 %v893_v12, %s1498_s28  ;;  %871 = vrot.lane.b32.xlu1 %v866_v21, %s1497_s26 }
 0x16a   : > { %v1951_v16 = vpop.permute.xlu0 %598  ;;  %v1972_v28 = vpop.permute.xlu1 %556 }
 0x16c   : > { %925 = vrot.lane.b32.xlu0 %v921_v19, %s1499_s30  ;;  %899 = vrot.lane.b32.xlu1 %v894_v29, %s1498_s28 }
 0x16e   : > { %v1962_v23 = vpop.permute.xlu0 %626  ;;  %v1983_v35 = vpop.permute.xlu1 %600 }
 0x170   : > { %1038 = vrot.lane.b32.xlu0 %v1034_v24, %s1498_s28  ;;  %927 = vrot.lane.b32.xlu1 %v922_v36, %s1499_s30 }
 0x172   : > { %v1975_v30 = vpop.permute.xlu0 %654  ;;  %v1994_v42 = vpop.permute.xlu1 %628 }
 0x174   : > { %969 = vrot.lane.b32.xlu0 %v965_v31, %s1496_s24  ;;  %1040 = vrot.lane.b32.xlu1 %v1035_v43, %s1498_s28 }
 0x176   : > { %v1986_v39 = vpop.permute.xlu0 %682  ;;  %v2005_v51 = vpop.permute.xlu1 %656 }
 0x178   : > { %997 = vrot.lane.b32.xlu0 %v993_v40, %s1497_s26  ;;  %971 = vrot.lane.b32.xlu1 %v966_v52, %s1496_s24  ;;  %s2050_s24 = sld [smem:[#allocation3 + $0x5]] }
 0x17a   : > { %v1999_v46 = vpop.permute.xlu0 %726  ;;  %v2014_v58 = vpop.permute.xlu1 %684 }
 0x17c   : > { %1025 = vrot.lane.b32.xlu0 %v1021_v47, %s1498_s28  ;;  %999 = vrot.lane.b32.xlu1 %v994_v60, %s1497_s26  ;;  %s2052_s26 = sld [smem:[#allocation3 + $0x1e]] }
 0x17e   : > { %v2008_v54 = vpop.permute.xlu0 %754  ;;  %v2022_v2 = vpop.permute.xlu1 %728  ;;  %v566_v56 = vstv %s2050_s24 }
 0x180   : > { %1053 = vrot.lane.b32.xlu0 %v1049_v55, %s1499_s30  ;;  %1027 = vrot.lane.b32.xlu1 %v1022_v3, %s1498_s28  ;;  %s2070_s28 = sld [smem:[#allocation3 + $0xa]] }
 0x182   : > { %v2017_v61 = vpop.permute.xlu0 %782  ;;  %v2028_v6 = vpop.permute.xlu1 %756  ;;  %v573_v3 = vstv %s2052_s26  ;;  %s1339_s26 = sshll.u32 %s1544_s16, 8  ;;  %s1425_s16 = scalar_lea.vmem %s2146_s8, 256 }
 0x183   : > { %p1426_p9 = scmp.ne.s32.totalorder %s2146_s8, %s1425_s16 }
 0x184   : > { %1066 = vrot.lane.b32.xlu0 %v1062_v1, %s1499_s30  ;;  %1055 = vrot.lane.b32.xlu1 %v1050_v9, %s1499_s30 }
 0x185   : > { %p1427_p10 = pnand %p1426_p9, %p1561_p5 }
 0x186   : > { %v2025_v5 = vpop.permute.xlu0 %810  ;;  %v2034_v13 = vpop.permute.xlu1 %784 }
 0x187   : > { %p1428_p12 = pneg %p1427_p10 }
 0x188   : > { %1068 = vrot.lane.b32.xlu1 %v1063_v15, %s1499_s30  ;;  %s2074_s30 = sld [smem:[#allocation3 + $0x23]] }
 0x18a   : > { %v2031_v12 = vpop.permute.xlu0 %854  ;;  %v2040_v8 = vpop.permute.xlu1 %812 }
 0x18e   : > { %v2037_v19 = vpop.permute.xlu0 %882  ;;  %v2044_v24 = vpop.permute.xlu1 %856 }
 0x192   : > { %v2042_v21 = vpop.permute.xlu0 %910  ;;  %v2047_v31 = vpop.permute.xlu1 %884 }
 0x196   : > { %v458_v26 = vpop.permute.xlu0 %457  ;;  %v2054_v41 = vpop.permute.xlu1 %912 }
 0x197   : > { %v463_v29 = vadd.f32 %v458_v26, %v1694_v17  ;;  %v567_v26 = vmul.f32 %v566_v56, %v1827_v18 }
 0x199   : > { %v476_v34 = vadd.f32 %v1907_v57, %v463_v29 }
 0x19a   : > { %v486_v36 = vpop.permute.xlu0 %485  ;;  %v460_v52 = vpop.permute.xlu1 %459 }
 0x19b   : > { %v491_v40 = vadd.f32 %v486_v36, %v476_v34  ;;  %v464_v55 = vadd.f32 %v460_v52, %v1731_v38  ;;  %v574_v36 = vmul.f32 %v573_v3, %v1701_v22 }
 0x19d   : > { %v504_v43 = vadd.f32 %v1918_v62, %v491_v40  ;;  %v477_v1 = vadd.f32 %v1935_v7, %v464_v55 }
 0x19e   : > { %v514_v47 = vpop.permute.xlu0 %513  ;;  %v488_v9 = vpop.permute.xlu1 %487 }
 0x19f   : > { %v519_v50 = vadd.f32 %v514_v47, %v504_v43  ;;  %v492_v29 = vadd.f32 %v488_v9, %v477_v1 }
 0x1a1   : > { %v532_v17 = vadd.f32 %v1927_v4, %v519_v50  ;;  %v505_v4 = vadd.f32 %v1948_v14, %v492_v29  ;;  %v568_v14 = vmul.f32 %v566_v56, %v1848_v27 }
 0x1a2   : > { %v542_v57 = vpop.permute.xlu0 %541  ;;  %v516_v38 = vpop.permute.xlu1 %515 }
 0x1a3   : > { %v547_v60 = vadd.f32 %v542_v57, %v532_v17  ;;  %v520_v43 = vadd.f32 %v516_v38, %v505_v4  ;;  %v701_v4 = vstv %s2074_s30 }
 0x1a5   : > { %v560_v15 = vadd.f32 %v1940_v11, %v547_v60  ;;  %v533_v7 = vadd.f32 %v1959_v20, %v520_v43  ;;  %v575_v60 = vmul.f32 %v573_v3, %v1721_v32 }
 0x1a6   : > { %v2064_v62 = vpop.permute.xlu0 %938  ;;  %v544_v52 = vpop.permute.xlu1 %543 }
 0x1a7   : > { %v569_v34 = vadd.f32 %v567_v26, %v560_v15  ;;  %v548_v17 = vadd.f32 %v544_v52, %v533_v7 }
 0x1a9   : > { %v576_v40 = vadd.f32 %v574_v36, %v569_v34  ;;  %v561_v22 = vadd.f32 %v1972_v28, %v548_v17  ;;  %v694_v36 = vstv %s2070_s28 }
 0x1aa   : > { %v586_v47 = vpop.permute.xlu0 %585  ;;  %v2076_v57 = vpop.permute.xlu1 %940 }
 0x1ab   : > { %v591_v50 = vadd.f32 %v586_v47, %v576_v40  ;;  %v702_v47 = vmul.f32 %v701_v4, %v1735_v0 }
 0x1ad   : > { %v604_v11 = vadd.f32 %v1951_v16, %v591_v50  ;;  %v570_v16 = vadd.f32 %v568_v14, %v561_v22 }
 0x1ae   : > { %v614_v18 = vpop.permute.xlu0 %613  ;;  %v588_v26 = vpop.permute.xlu1 %587 }
 0x1af   : > { %v619_v55 = vadd.f32 %v614_v18, %v604_v11  ;;  %v577_v15 = vadd.f32 %v575_v60, %v570_v16 }
 0x1b1   : > { %v632_v20 = vadd.f32 %v1962_v23, %v619_v55  ;;  %v592_v34 = vadd.f32 %v588_v26, %v577_v15  ;;  %v695_v23 = vmul.f32 %v694_v36, %v1868_v37 }
 0x1b2   : > { %v642_v1 = vpop.permute.xlu0 %641  ;;  %v616_v38 = vpop.permute.xlu1 %615 }
 0x1b3   : > { %v647_v9 = vadd.f32 %v642_v1, %v632_v20  ;;  %v605_v56 = vadd.f32 %v1983_v35, %v592_v34  ;;  %v703_v20 = vmul.f32 %v701_v4, %v1756_v48 }
 0x1b5   : > { %v660_v29 = vadd.f32 %v1975_v30, %v647_v9  ;;  %v620_v32 = vadd.f32 %v616_v38, %v605_v56 }
 0x1b6   : > { %v670_v28 = vpop.permute.xlu0 %669  ;;  %v644_v50 = vpop.permute.xlu1 %643 }
 0x1b7   : > { %v675_v27 = vadd.f32 %v670_v28, %v660_v29  ;;  %v633_v30 = vadd.f32 %v1994_v42, %v620_v32  ;;  %v696_v42 = vmul.f32 %v694_v36, %v1891_v49  ;;  %v822_v29 = vstv %s2092_s9 }
 0x1b8   : > { %v829_v28 = vstv %s2096_s10  ;;  %s2151_s10 = scalar_lea.hbm %s2199_s3, %s1339_s26 }
 0x1b9   : > { %v688_v40 = vadd.f32 %v1986_v39, %v675_v27  ;;  %v648_v52 = vadd.f32 %v644_v50, %v633_v30  ;;  %v830_v38 = vmul.f32 %v829_v28, %v1767_v53 }
 0x1ba   : > { %v2086_v3 = vpop.permute.xlu0 %982  ;;  %v672_v18 = vpop.permute.xlu1 %671 }
 0x1bb   : > { %v697_v43 = vadd.f32 %v695_v23, %v688_v40  ;;  %v661_v35 = vadd.f32 %v2005_v51, %v648_v52 }
 0x1bd   : > { %v704_v7 = vadd.f32 %v702_v47, %v697_v43  ;;  %v676_v55 = vadd.f32 %v672_v18, %v661_v35 }
 0x1be   : > { %v714_v11 = vpop.permute.xlu0 %713  ;;  %v2098_v14 = vpop.permute.xlu1 %984 }
 0x1bf   : > { %v719_v17 = vadd.f32 %v714_v11, %v704_v7  ;;  %v689_v0 = vadd.f32 %v2014_v58, %v676_v55 }
 0x1c1   : > { %v732_v39 = vadd.f32 %v1999_v46, %v719_v17  ;;  %v698_v46 = vadd.f32 %v696_v42, %v689_v0  ;;  %v957_v42 = vstv %s2116_s17  ;;  %s1500_s17 = smov [#allocation6]  }
 0x1c2   : > { %v742_v37 = vpop.permute.xlu0 %741  ;;  %v716_v9 = vpop.permute.xlu1 %715  ;;  %s1429_s19 = sshll.u32 %s1500_s17, 4  ;;  %s1430_s19 = int_to_ptr.vmem [resolvable:$false] %s1429_s19 }
 0x1c3   : > { %v747_v22 = vadd.f32 %v742_v37, %v732_v39  ;;  %v705_v1 = vadd.f32 %v703_v20, %v698_v46  ;;  %s1431_s20 = scalar_lea.vmem %s1430_s19, 512  ;;  %p1432_p13 = scmp.lt.s32.totalorder %s2146_s8, %s1430_s19 }
 0x1c4   : > { %p1433_p0 = scmp.lt.s32.totalorder %s1431_s20, %s1425_s16 }
 0x1c5   : > { %v760_v51 = vadd.f32 %v2008_v54, %v747_v22  ;;  %v720_v26 = vadd.f32 %v716_v9, %v705_v1  ;;  %v823_v54 = vmul.f32 %v822_v29, %v1911_v59 }
 0x1c6   : > { %v770_v60 = vpop.permute.xlu0 %769  ;;  %v744_v36 = vpop.permute.xlu1 %743  ;;  %p1434_p1 = por %p1433_p0, %p1432_p13 }
 0x1c7   : > { %v775_v16 = vadd.f32 %v770_v60, %v760_v51  ;;  %v733_v34 = vadd.f32 %v2022_v2, %v720_v26 }
 0x1c8   : > { %p1435_p2 = pnand %p1434_p1, %p1428_p12 }
 0x1c9   : > { %v788_v15 = vadd.f32 %v2017_v61, %v775_v16  ;;  %v748_v48 = vadd.f32 %v744_v36, %v733_v34  ;;  %v958_v16 = vmul.f32 %v957_v42, %v1859_v33 }
 0x1ca   : > { %v798_v58 = vpop.permute.xlu0 %797  ;;  %v772_v61 = vpop.permute.xlu1 %771 }
 0x1cb   : > { %v803_v49 = vadd.f32 %v798_v58, %v788_v15  ;;  %v761_v40 = vadd.f32 %v2028_v6, %v748_v48  ;;  %v824_v6 = vmul.f32 %v822_v29, %v1938_v10 }
 0x1cd   : > { %v816_v27 = vadd.f32 %v2025_v5, %v803_v49  ;;  %v776_v32 = vadd.f32 %v772_v61, %v761_v40 }
 0x1ce   : > { %v1011_v56 = vpop.permute.xlu0 %1010  ;;  %v800_v30 = vpop.permute.xlu1 %799 }
 0x1cf   : > { %v825_v4 = vadd.f32 %v823_v54, %v816_v27  ;;  %v789_v2 = vadd.f32 %v2034_v13, %v776_v32  ;;  %v831_v13 = vmul.f32 %v829_v28, %v1789_v63 }
 0x1d1   : > { %v832_v23 = vadd.f32 %v830_v38, %v825_v4  ;;  %v804_v5 = vadd.f32 %v800_v30, %v789_v2  ;;  %v1075_v30 = vld [vmem:[%s2198_s2 + $0x8] sm:$0xff] }
 0x1d2   : > { %v842_v43 = vpop.permute.xlu0 %841  ;;  %v1013_v52 = vpop.permute.xlu1 %1012 }
 0x1d3   : > { %v847_v47 = vadd.f32 %v842_v43, %v832_v23  ;;  %v817_v53 = vadd.f32 %v2040_v8, %v804_v5  ;;  %v950_v8 = vstv %s2112_s11  ;;  %s2155_s11 = scalar_lea.sflag [#allocation4], %s175_s5 }
 0x1d4   : > { %v952_v36 = vmul.f32 %v950_v8, %v1997_v45  ;;  %v1074_v45 = vld [vmem:[%s2198_s2] sm:$0xff] }
 0x1d5   : > { %v860_v50 = vadd.f32 %v2031_v12, %v847_v47  ;;  %v826_v17 = vadd.f32 %v824_v6, %v817_v53  ;;  %v1078_v5 = vsub.f32 1.0, %v1074_v45 }
 0x1d6   : > { %v870_v7 = vpop.permute.xlu0 %869  ;;  %v844_v39 = vpop.permute.xlu1 %843 }
 0x1d7   : > { %v875_v59 = vadd.f32 %v870_v7, %v860_v50  ;;  %v833_v18 = vadd.f32 %v831_v13, %v826_v17  ;;  %v1080_v6 = vmul.f32 -1e+08, %v1078_v5 }
 0x1d9   : > { %v888_v11 = vadd.f32 %v2037_v19, %v875_v59  ;;  %v848_v37 = vadd.f32 %v844_v39, %v833_v18  ;;  %v951_v19 = vmul.f32 %v950_v8, %v1966_v25  ;;  %v1079_v59 = vsub.f32 1.0, %v1075_v30 }
 0x1da   : > { %v898_v12 = vpop.permute.xlu0 %897  ;;  %v872_v51 = vpop.permute.xlu1 %871 }
 0x1db   : > { %v903_v35 = vadd.f32 %v898_v12, %v888_v11  ;;  %v861_v10 = vadd.f32 %v2044_v24, %v848_v37  ;;  %v1081_v13 = vmul.f32 -1e+08, %v1079_v59 }
 0x1dd   : > { %v916_v55 = vadd.f32 %v2042_v21, %v903_v35  ;;  %v876_v63 = vadd.f32 %v872_v51, %v861_v10 }
 0x1de   : > { %v926_v22 = vpop.permute.xlu0 %925  ;;  %v900_v21 = vpop.permute.xlu1 %899 }
 0x1df   : > { %v931_v0 = vadd.f32 %v926_v22, %v916_v55  ;;  %v889_v1 = vadd.f32 %v2047_v31, %v876_v63  ;;  %v959_v31 = vmul.f32 %v957_v42, %v1882_v44 }
 0x1e1   : > { %v944_v20 = vadd.f32 %v2064_v62, %v931_v0  ;;  %v904_v15 = vadd.f32 %v900_v21, %v889_v1 }
 0x1e2   : > { %v1039_v46 = vpop.permute.xlu0 %1038  ;;  %v928_v29 = vpop.permute.xlu1 %927 }
 0x1e3   : > { %v953_v60 = vadd.f32 %v951_v19, %v944_v20  ;;  %v917_v24 = vadd.f32 %v2054_v41, %v904_v15 }
 0x1e5   : > { %v960_v9 = vadd.f32 %v958_v16, %v953_v60  ;;  %v932_v62 = vadd.f32 %v928_v29, %v917_v24 }
 0x1e6   : > { %v970_v26 = vpop.permute.xlu0 %969  ;;  %v1041_v33 = vpop.permute.xlu1 %1040 }
 0x1e7   : > { %v975_v58 = vadd.f32 %v970_v26, %v960_v9  ;;  %v945_v28 = vadd.f32 %v2076_v57, %v932_v62 }
 0x1e9   : > { %v988_v49 = vadd.f32 %v2086_v3, %v975_v58  ;;  %v954_v27 = vadd.f32 %v952_v36, %v945_v28 }
 0x1ea   : > { %v998_v34 = vpop.permute.xlu0 %997  ;;  %v972_v38 = vpop.permute.xlu1 %971 }
 0x1eb   : > { %v1003_v25 = vadd.f32 %v998_v34, %v988_v49  ;;  %v961_v4 = vadd.f32 %v959_v31, %v954_v27 }
 0x1ed   : > { %v1016_v54 = vadd.f32 %v1011_v56, %v1003_v25  ;;  %v976_v40 = vadd.f32 %v972_v38, %v961_v4 }
 0x1ee   : > { %v1026_v48 = vpop.permute.xlu0 %1025  ;;  %v1000_v23 = vpop.permute.xlu1 %999 }
 0x1ef   : > { %v1031_v41 = vadd.f32 %v1026_v48, %v1016_v54  ;;  %v989_v3 = vadd.f32 %v2098_v14, %v976_v40 }
 0x1f1   : > { %v1004_v32 = vadd.f32 %v1000_v23, %v989_v3  ;;  %v1044_v43 = vadd.f32 %v1039_v46, %v1031_v41 }
 0x1f2   : > { %v1054_v61 = vpop.permute.xlu0 %1053  ;;  %v1028_v57 = vpop.permute.xlu1 %1027 }
 0x1f3   : > { %v1017_v47 = vadd.f32 %v1013_v52, %v1004_v32  ;;  %v1059_v56 = vadd.f32 %v1054_v61, %v1044_v43 }
 0x1f5   : > { %v1032_v2 = vadd.f32 %v1028_v57, %v1017_v47 }
 0x1f6   : > { %v1067_v44 = vpop.permute.xlu0 %1066  ;;  %v1056_v14 = vpop.permute.xlu1 %1055 }
 0x1f7   : > { %v1045_v50 = vadd.f32 %v1041_v33, %v1032_v2  ;;  %v1072_v7 = vadd.f32 %v1067_v44, %v1059_v56 }
 0x1f9   : > { %v1060_v53 = vadd.f32 %v1056_v14, %v1045_v50  ;;  %v1076_v52 = vmul.f32 %v1074_v45, %v1072_v7 }
 0x1fa   : > { %v1069_v11 = vpop.permute.xlu1 %1068 }
 0x1fb   : > { %v1073_v17 = vadd.f32 %v1069_v11, %v1060_v53  ;;  %v1082_v35 = vadd.f32 %v1080_v6, %v1076_v52 }
 0x1fd   : > { %v1077_v12 = vmul.f32 %v1075_v30, %v1073_v17  ;;  %v1085_v39 = vsel %vm1084_vm3, %v1082_v35, -inf }
 0x1ff   : > { %v1083_v18 = vadd.f32 %v1081_v13, %v1077_v12 }
 0x201   : > { %v1086_v55 = vsel %vm1084_vm3, %v1083_v18, -inf }
 0x202   : > { %v1087_v37 = vmax.f32 %v1085_v39, %v1086_v55 }
 0x204   : > { %1088 = vmax.xlane.f32.xlu0 %v1087_v37 }
 0x291   : > { %v1089_v22 = vpop.xlane.xlu0 %1088 }
 0x292   : > { %v1090_v8 = vrot.slane %v1089_v22, 4 }
 0x294   : > { %v1091_v0 = vmax.f32 %v1089_v22, %v1090_v8 }
 0x296   : > { %v1092_v10 = vrot.slane %v1091_v0, 2 }
 0x298   : > { %v1093_v42 = vmax.f32 %v1091_v0, %v1092_v10 }
 0x29a   : > { %v1094_v51 = vrot.slane %v1093_v42, 1 }
 0x29c   : > { %v1095_v20 = vmax.f32 %v1093_v42, %v1094_v51 }
 0x29e   : > { %1340 = vpush %v1095_v20 }
 0x2cf   : > { %s1341_s29 = spop %1340 }
 0x2d0   : > { %v1097_v19 = vstv %s1341_s29 }
 0x2d1   : > { %v1098_v63 = vsub.f32 %v1082_v35, %v1097_v19  ;;  %v1099_v46 = vsub.f32 %v1083_v18, %v1097_v19 }
 0x2d3   : > { %v1100_v60 = vmul.f32 1.442695, %v1098_v63  ;;  %v1102_v16 = vmul.f32 1.442695, %v1099_v46 }
 0x2d5   : > { %1404 = vpow2.f32 %v1100_v60 }
 0x2d6   : > { %1406 = vpow2.f32 %v1102_v16 }
 0x2df   : > { %v1405_v1 = vpop.eup %1404 }
 0x2e0   : > { %v1407_v21 = vpop.eup %1406  ;;  %v1104_v9 = vsel %vm1084_vm3, %v1405_v1, 0.0 }
 0x2e1   : > { %v1105_v15 = vsel %vm1084_vm3, %v1407_v21, 0.0 }
 0x2e2   : > { %v1106_v26 = vadd.f32 %v1105_v15, %v1104_v9 }
 0x2e4   : > { %1107 = vadd.xlane.f32.xlu1 %v1106_v26 }
 0x371   : > { %v1108_v58 = vpop.xlane.xlu1 %1107 }
 0x372   : > { %v1109_v24 = vrot.slane %v1108_v58, 4 }
 0x374   : > { %v1110_v29 = vadd.f32 %v1109_v24, %v1108_v58 }
 0x376   : > { %v1111_v49 = vrot.slane %v1110_v29, 2 }
 0x378   : > { %v1112_v62 = vadd.f32 %v1111_v49, %v1110_v29 }
 0x37a   : > { %v1113_v34 = vrot.slane %v1112_v62, 1 }
 0x37c   : > { %v1114_v25 = vadd.f32 %v1113_v34, %v1112_v62 }
 0x37e   : > { %1342 = vpush %v1114_v25 }
 0x3af   : > { %s1343_s4 = spop %1342 }
 0x3b0   : > { %v1116_v28 = vstv %s1343_s4 }
 0x3b1   : > { %1408 = vrcp.f32 %v1116_v28 }
 0x3bb   : > { %v1409_v36 = vpop.eup %1408 }
 0x3bc   : > { %1344 = vpush %v1409_v36 }
 0x3ed   : > { %s1345_s24 = spop %1344 }
 0x3ee   : > { %s1119_s28 = smul.f32 128.0, %s1345_s24 }
 0x3f0   : > { %v1120_v33 = vstv %s1119_s28 }
 0x3f1   : > { %v1121_v31 = vmul.f32 %v1405_v1, %v1120_v33  ;;  %v1122_v27 = vmul.f32 %v1407_v21, %v1120_v33 }
 0x3f3   : > { %1123 = vst.msk [vmem:[%s177_s7] sm:$0xff] %vm1084_vm3, %v1121_v31  ;;  %1124 = vst.msk [vmem:[%s177_s7 + $0x8] sm:$0xff] %vm1084_vm3, %v1122_v27 }
 0x3f4   : > { %1438 = shalt.err (!%p1435_p2)
}
 0x3f5   : > { %s1439_s25 = scalar_lea.hbm %s2151_s10, 256  ;;  %s1443_s4 = scalar_lea.hbm %s2199_s3, 512 }
 0x3f6   : > { %p1440_p3 = scmp.ne.s32.totalorder %s2151_s10, %s1439_s25  ;;  %p1444_p8 = scmp.lt.u32.totalorder %s2151_s10, %s2199_s3 }
 0x3f7   : > { %p1445_p11 = scmp.lt.u32.totalorder %s1443_s4, %s1439_s25  ;;  %p1447_p10 = scmp.lt.u32.totalorder %s1439_s25, %s2151_s10 }
 0x3f8   : > { %p1441_p4 = pnand %p1440_p3, %p1561_p5 }
 0x3f9   : > { %p1446_p9 = por %p1445_p11, %p1444_p8 }
 0x3fa   : > { %p1442_p7 = pneg %p1441_p4 }
 0x3fb   : > { %p1448_p12 = por %p1447_p10, %p1446_p9 }
 0x3fd   : > { %p1449_p13 = pnand %p1448_p12, %p1442_p7 }
 0x3ff   : > { %1452 = shalt.err (!%p1449_p13)
}
 0x400   : > { %s1501_s7 = smov 128   ;;  %s1502_s24 = smov 8  }
 0x401   : > { %1350 = dma.vmem_to_hbm [thread:$0]  (%p1561_p5), %s2146_s8, 256, %s2151_s10, %s2155_s11, %s1501_s7, %s1501_s7, %s1502_s24  }
 0x402 PF: > { %p1362_p0 = scmp.ge.s32.totalorder %s1491_s15, 2  ;;  %s1154_s26 = sand.u32 1, %s1479_s12  }
 0x403   : > { %s1155_s28 = scalar_lea.sflag [#allocation4], %s1154_s26 }
 0x404   : > { %p1357_p1 = pnand %p1362_p0, %p1565_p6 }
 0x406   : > { %1474 = dma.done.wait (!%p1357_p1), %s1155_s28, 256  }
 0x407   : > { %1476 = vsyncadd (!%p1357_p1), %s1155_s28, 4294967040  ;;  %p14_p2 = scmp.ge.s32.totalorder %s1548_s18, 4   ;;  %s2203_s12 = smov %s1483_s13 }
 0x408   : > { %s2204_s13 = smov %s1487_s14  ;;  %s2205_s14 = smov %s1559_s21 }
 0x409   : > { %s2206_s15 = smov %s1548_s18  ;;  %16 = sbr.rel (!%p14_p2) target bundleno = 4 (0x4), region = 104 }
 0x410   :  { %1160 = vsyncpa [#allocation4], 1 }
 0x411   :  { %1162 = vsyncpa [#allocation4 + $0x1], 1 }
 0x412   :  { %1163 = vsyncpa [#allocation5], 1 }
 0x413   :  { %1165 = vsyncpa [#allocation5 + $0x1], 1 }

</bundles_post_ra>
